<compile_context>
chip_gen: v7x
topology: tpu7x:2x2x1
jax: 0.10.0
libtpu: 0.0.40
codegen_flags: <defaults>
</compile_context>

<pallas_src>
import functools

import jax
import jax.numpy as jnp
import numpy as np
from jax.experimental import pallas as pl
from jax.experimental.pallas import tpu as pltpu


def encoder_kernel(x_ref, vec_ref, wqkv_ref, wo_ref, w1_ref, w2_ref, sel_ref,
                   o_ref, *, num_head, seq_len):
    R, E = x_ref.shape                 # R = b_tile * seq_len fused rows
    H, L = num_head, seq_len
    B = R // L                         # batch elements fused into this grid step
    hd = E // H

    # ---- unpack the single packed vector param (one vreg: (8, 4E) f32) ----
    vecs = vec_ref[...]
    g0 = vecs[0:1, :E]
    be0 = vecs[1:2, :E]
    bqkv = vecs[2:3, :3 * E]           # 1/sqrt(hd) already folded into the q-third
    bo = vecs[3:4, :E]
    g1 = vecs[4:5, :E]
    be1 = vecs[5:6, :E]
    c1 = vecs[6:7, :4 * E]
    c2 = vecs[7:8, :E]

    def layer_norm(t, g, b):           # f32 throughout
        mu = jnp.mean(t, axis=-1, keepdims=True)
        var = jnp.mean((t - mu) ** 2, axis=-1, keepdims=True)
        return (t - mu) * jax.lax.rsqrt(var + 1e-5) * g + b

    def mm(a, w_bf16):                 # activation->bf16 cast only; weights already bf16
        return jnp.dot(a.astype(jnp.bfloat16), w_bf16,
                       preferred_element_type=jnp.float32)

    x = x_ref[...]                                               # (R, E) f32

    # ---- LayerNorm 0 + fused QKV projection over the whole row slab ----
    y0 = layer_norm(x, g0, be0)
    qkv = mm(y0, wqkv_ref[...]) + bqkv                           # (R, 3E) f32
    q3 = qkv[:, :E].reshape(B, L, E).astype(jnp.bfloat16)
    k3 = qkv[:, E:2 * E].reshape(B, L, E).astype(jnp.bfloat16)
    v3 = qkv[:, 2 * E:].reshape(B, L, E).astype(jnp.bfloat16)

    # ---- attention, batched over heads AND the fused batch ----
    # Head-major restack: (H*B, L, hd) with index hb = h*B + b.
    q4 = jnp.concatenate([q3[:, :, h * hd:(h + 1) * hd] for h in range(H)], axis=0)
    k4 = jnp.concatenate([k3[:, :, h * hd:(h + 1) * hd] for h in range(H)], axis=0)
    v4 = jnp.concatenate([v3[:, :, h * hd:(h + 1) * hd] for h in range(H)], axis=0)

    s = jnp.einsum('bqd,bkd->bqk', q4, k4,
                   preferred_element_type=jnp.float32)           # (H*B, L, L) f32
    s = s - jnp.max(s, axis=-1, keepdims=True)                   # one batched softmax
    p = jnp.exp(s)
    p = p * pl.reciprocal(jnp.sum(p, axis=-1, keepdims=True), approx=True)
    att = jnp.einsum('bqk,bkd->bqd', p.astype(jnp.bfloat16), v4,
                     preferred_element_type=jnp.float32)         # (H*B, L, hd) f32
    att2d = att.reshape(H * B * L, hd).astype(jnp.bfloat16)      # row order (h, b, l)

    # ---- torch's buggy reshape (B, H, L, hd) -> (B, L, E) ----
    # H host-precomputed 0/1 bf16 selection matmuls (exact, VMEM-resident constants,
    # no in-kernel iota/mask work, no f32 MXU emulation).
    atten = jnp.concatenate(
        [jnp.dot(sel_ref[j], att2d, preferred_element_type=jnp.float32)
         for j in range(H)],
        axis=-1)                                                 # (R, E), buggy layout

    # ---- output projection + residual 1, LayerNorm 1 + MLP + residual 2 ----
    x_res = mm(atten, wo_ref[...]) + bo + x
    y1 = layer_norm(x_res, g1, be1)
    h1 = mm(y1, w1_ref[...]) + c1
    h1 = jnp.where(h1 >= 0, h1, 0.01 * h1)                       # LeakyReLU(0.01)
    o_ref[...] = (mm(h1, w2_ref[...]) + c2 + x_res).astype(o_ref.dtype)


def _num_tensorcores_per_chip():
    # v7x has 2 TensorCores per chip; v5e/v6e have 1.  Conservative fallback: 1.
    try:
        kind = jax.devices()[0].device_kind.lower()
    except Exception:
        kind = ""
    return 2 if "v7" in kind else 1


def _pick_b_tile(bs, seq_len):
    # Aim for ~128 fused MXU rows (b_tile * L) per grid step to fill the MXU M dimension
    # and amortize the ~0.35us/step grid overhead.  On 1-TC chips (v5e/v6e) the grid is a
    # sequential loop, so prefer a SINGLE step whenever the batch allows; only on 2-TC
    # chips (v7x) force >= 2 steps so both TensorCores get work.
    b_tile = max(1, min(bs, max(1, 128 // max(seq_len, 1))))
    while bs % b_tile:
        b_tile -= 1
    if _num_tensorcores_per_chip() > 1 and bs >= 2 and bs // b_tile < 2:
        b_tile = max(d for d in range(1, bs // 2 + 1) if bs % d == 0)
    return b_tile


def _selection_masks(b_tile, seq_len, num_head):
    # 0/1 masks for torch's buggy (B, H, L, hd)->(B, L, E) reshape, with the attention
    # output stacked head-major (row index = h*B*L + b*L + l).  Output row rho = b*L + l,
    # lane block j sources row h'*B*L + b*L + lk with h' = (l*H+j)//L, lk = (l*H+j)%L.
    # NOTE: size grows as (b_tile*L)^2 * H; at realistic shapes re-check the VMEM budget
    # (64 MiB on v7x) before growing b_tile.
    B, L, H = b_tile, seq_len, num_head
    R, S = B * L, B * H * L
    rho = np.arange(R)
    b_i, l_i = rho // L, rho % L
    sel = np.zeros((H, R, S), dtype=np.float32)
    for j in range(H):
        hsel = (l_i * H + j) // L
        lk = (l_i * H + j) % L
        src = hsel * (B * L) + b_i * L + lk
        sel[j, rho, src] = 1.0
    return jnp.asarray(sel, dtype=jnp.bfloat16)


def transformer_encoder(x, params, *, num_head, b_tile=None):
    (g0, be0, wq, bq, wk, bk, wv, bv, wo, bo, g1, be1, w1, c1, w2, c2) = params
    bs, L, E = x.shape
    H = num_head
    assert E % H == 0
    hd = E // H
    scale = hd ** -0.5

    if b_tile is None:
        b_tile = _pick_b_tile(bs, L)
    assert bs % b_tile == 0
    rows = b_tile * L
    assert rows % 8 == 0 or rows == bs * L, "row tile must satisfy TPU sublane tiling"

    # ---- one-time host-side parameter preprocessing (would be cached in practice) ----
    # Fused QKV weight/bias with 1/sqrt(hd) folded into the q-third; weights stored bf16.
    wqkv = jnp.concatenate([wq * scale, wk, wv], axis=1).astype(jnp.bfloat16)   # (E, 3E)
    bqkv = jnp.concatenate([bq * scale, bk, bv], axis=1)                        # (1, 3E) f32
    wo_b = wo.astype(jnp.bfloat16)
    w1_b = w1.astype(jnp.bfloat16)
    w2_b = w2.astype(jnp.bfloat16)
    sel = _selection_masks(b_tile, L, H)                                        # (H, R, B*H*L) bf16

    # Pack all gain/bias vectors into one (8, 4E) f32 slab (a single vreg at E=32).
    W4 = 4 * E

    def pad_row(v):
        v = v.reshape(1, -1)
        return jnp.pad(v, ((0, 0), (0, W4 - v.shape[1])))

    vecs = jnp.concatenate(
        [pad_row(g0), pad_row(be0), pad_row(bqkv), pad_row(bo),
         pad_row(g1), pad_row(be1), pad_row(c1), pad_row(c2)], axis=0)          # (8, 4E)

    # Flatten (bs, L, E) -> (bs*L, E) on the wrapper side (free, row-major) so each grid
    # step sees one dense slab of MXU rows.
    x2 = x.reshape(bs * L, E)

    weights = [vecs, wqkv, wo_b, w1_b, w2_b, sel]
    in_specs = [pl.BlockSpec((rows, E), lambda i: (i, 0))]
    for p in weights:
        # Constant index_map -> weights/masks stay VMEM-resident across grid steps.
        in_specs.append(pl.BlockSpec(p.shape, lambda i, n=p.ndim: (0,) * n))

    out2 = pl.pallas_call(
        functools.partial(encoder_kernel, num_head=H, seq_len=L),
        out_shape=jax.ShapeDtypeStruct((bs * L, E), x.dtype),
        grid=(bs // b_tile,),
        in_specs=in_specs,
        out_specs=pl.BlockSpec((rows, E), lambda i: (i, 0)),
        compiler_params=pltpu.CompilerParams(dimension_semantics=("parallel",)),
    )(x2, *weights)
    return out2.reshape(bs, L, E)


def reference(x, params, *, num_head):
    (g0, be0, wq, bq, wk, bk, wv, bv, wo, bo, g1, be1, w1, c1, w2, c2) = params
    bs, L, E = x.shape
    hd = E // num_head

    def ln(t, g, b):
        mu = t.mean(-1, keepdims=True)
        var = ((t - mu) ** 2).mean(-1, keepdims=True)
        return (t - mu) / jnp.sqrt(var + 1e-5) * g + b

    y0 = ln(x, g0, be0)
    q = y0 @ wq + bq
    k = y0 @ wk + bk
    v = y0 @ wv + bv
    qh = q.reshape(bs, L, num_head, hd).transpose(0, 2, 1, 3)
    kh = k.reshape(bs, L, num_head, hd).transpose(0, 2, 1, 3)
    vh = v.reshape(bs, L, num_head, hd).transpose(0, 2, 1, 3)
    s = jnp.einsum('bhqd,bhkd->bhqk', qh, kh) * hd ** (-0.5)
    p = jax.nn.softmax(s, axis=-1)
    att = jnp.einsum('bhqk,bhkd->bhqd', p, vh)
    att = att.reshape(bs, L, E)          # torch's (buggy) reshape, no head re-permute
    att = att @ wo + bo
    x_res = att + x
    y1 = ln(x_res, g1, be1)
    h = y1 @ w1 + c1
    h = jnp.where(h >= 0, h, 0.01 * h)
    return h @ w2 + c2 + x_res


if __name__ == "__main__":
    BS, L, E, H = 4, 8, 32, 4

    key = jax.random.PRNGKey(0)
    ks = jax.random.split(key, 20)

    def rnd(k, shape, scale=0.1):
        return (scale * jax.random.normal(k, shape)).astype(jnp.float32)

    # Parameters (Linear weights stored pre-transposed as (in, out) so the kernel
    # computes y = x @ W + b, matching torch's x @ W.T + b).
    g0 = 1.0 + rnd(ks[0], (1, E))
    be0 = rnd(ks[1], (1, E))
    wq, bq = rnd(ks[2], (E, E)), rnd(ks[3], (1, E))
    wk, bk = rnd(ks[4], (E, E)), rnd(ks[5], (1, E))
    wv, bv = rnd(ks[6], (E, E)), rnd(ks[7], (1, E))
    wo, bo = rnd(ks[8], (E, E)), rnd(ks[9], (1, E))
    g1 = 1.0 + rnd(ks[10], (1, E))
    be1 = rnd(ks[11], (1, E))
    w1, c1 = rnd(ks[12], (E, 4 * E)), rnd(ks[13], (1, 4 * E))
    w2, c2 = rnd(ks[14], (4 * E, E)), rnd(ks[15], (1, E))

    params = [g0, be0, wq, bq, wk, bk, wv, bv, wo, bo, g1, be1, w1, c1, w2, c2]

    x = jax.random.normal(ks[16], (BS, L, E), dtype=jnp.float32)

    out = jax.block_until_ready(transformer_encoder(x, params, num_head=H))

    ref = reference(x, params, num_head=H)
    # Kernel uses bf16 MXU operands (f32 accumulate) + approximate reciprocal for the
    # softmax denominator -> tolerance sized for bf16 rounding vs the f32 reference.
    np.testing.assert_allclose(np.asarray(out), np.asarray(ref), rtol=3e-2, atol=3e-2)

    print("KERNEL_OK")
</pallas_src>

<mosaic_0001>
module attributes {stable_mosaic.version = 11 : i64} {
  func.func @encoder_kernel(%arg0: i32, %arg1: memref<32x32xf32, #tpu.memory_space<vmem>>, %arg2: memref<8x128xf32, #tpu.memory_space<vmem>>, %arg3: memref<32x96xbf16, #tpu.memory_space<vmem>>, %arg4: memref<32x32xbf16, #tpu.memory_space<vmem>>, %arg5: memref<32x128xbf16, #tpu.memory_space<vmem>>, %arg6: memref<128x32xbf16, #tpu.memory_space<vmem>>, %arg7: memref<4x32x128xbf16, #tpu.memory_space<vmem>>, %arg8: memref<32x32xf32, #tpu.memory_space<vmem>>) attributes {dimension_semantics = [#tpu.dimension_semantics<parallel>], iteration_bounds = array<i64: 1>, scalar_prefetch = 0 : i64, scratch_operands = 0 : i64, tpu.core_type = #tpu.core_type<tc>, window_params = [{transform_indices = @transform_0, window_bounds = array<i64: 32, 32>}, {pipeline_mode = #tpu.pipeline_mode<synchronous>, transform_indices = @transform_1, window_bounds = array<i64: 8, 128>}, {pipeline_mode = #tpu.pipeline_mode<synchronous>, transform_indices = @transform_2, window_bounds = array<i64: 32, 96>}, {pipeline_mode = #tpu.pipeline_mode<synchronous>, transform_indices = @transform_3, window_bounds = array<i64: 32, 32>}, {pipeline_mode = #tpu.pipeline_mode<synchronous>, transform_indices = @transform_4, window_bounds = array<i64: 32, 128>}, {pipeline_mode = #tpu.pipeline_mode<synchronous>, transform_indices = @transform_5, window_bounds = array<i64: 128, 32>}, {pipeline_mode = #tpu.pipeline_mode<synchronous>, transform_indices = @transform_6, window_bounds = array<i64: 4, 32, 128>}, {transform_indices = @transform_7, window_bounds = array<i64: 32, 32>}]} {
    %c0 = arith.constant 0 : index
    %c0_0 = arith.constant 0 : index
    %0 = vector.load %arg2[%c0, %c0_0] : memref<8x128xf32, #tpu.memory_space<vmem>>, vector<8x128xf32>
    %1 = vector.extract_strided_slice %0 {offsets = [0, 0], sizes = [1, 32], strides = [1, 1]} : vector<8x128xf32> to vector<1x32xf32>
    %2 = vector.extract_strided_slice %0 {offsets = [1, 0], sizes = [1, 32], strides = [1, 1]} : vector<8x128xf32> to vector<1x32xf32>
    %3 = vector.extract_strided_slice %0 {offsets = [2, 0], sizes = [1, 96], strides = [1, 1]} : vector<8x128xf32> to vector<1x96xf32>
    %4 = vector.extract_strided_slice %0 {offsets = [3, 0], sizes = [1, 32], strides = [1, 1]} : vector<8x128xf32> to vector<1x32xf32>
    %5 = vector.extract_strided_slice %0 {offsets = [4, 0], sizes = [1, 32], strides = [1, 1]} : vector<8x128xf32> to vector<1x32xf32>
    %6 = vector.extract_strided_slice %0 {offsets = [5, 0], sizes = [1, 32], strides = [1, 1]} : vector<8x128xf32> to vector<1x32xf32>
    %7 = vector.extract_strided_slice %0 {offsets = [6, 0], sizes = [1, 128], strides = [1, 1]} : vector<8x128xf32> to vector<1x128xf32>
    %8 = vector.extract_strided_slice %0 {offsets = [7, 0], sizes = [1, 32], strides = [1, 1]} : vector<8x128xf32> to vector<1x32xf32>
    %c0_1 = arith.constant 0 : index
    %c0_2 = arith.constant 0 : index
    %9 = vector.load %arg1[%c0_1, %c0_2] : memref<32x32xf32, #tpu.memory_space<vmem>>, vector<32x32xf32>
    %cst = arith.constant dense<0.000000e+00> : vector<32xf32>
    %10 = vector.multi_reduction <add>, %9, %cst [1] : vector<32x32xf32> to vector<32xf32>
    %11 = vector.shape_cast %10 : vector<32xf32> to vector<32x1xf32>
    %cst_3 = arith.constant 3.200000e+01 : f32
    %12 = vector.broadcast %cst_3 : f32 to vector<32x1xf32>
    %13 = arith.divf %11, %12 : vector<32x1xf32>
    %14 = vector.broadcast %13 : vector<32x1xf32> to vector<32x32xf32>
    %15 = arith.subf %9, %14 : vector<32x32xf32>
    %16 = arith.mulf %15, %15 : vector<32x32xf32>
    %cst_4 = arith.constant dense<0.000000e+00> : vector<32xf32>
    %17 = vector.multi_reduction <add>, %16, %cst_4 [1] : vector<32x32xf32> to vector<32xf32>
    %18 = vector.shape_cast %17 : vector<32xf32> to vector<32x1xf32>
    %cst_5 = arith.constant 3.200000e+01 : f32
    %19 = vector.broadcast %cst_5 : f32 to vector<32x1xf32>
    %20 = arith.divf %18, %19 : vector<32x1xf32>
    %21 = vector.broadcast %13 : vector<32x1xf32> to vector<32x32xf32>
    %22 = arith.subf %9, %21 : vector<32x32xf32>
    %cst_6 = arith.constant 9.99999974E-6 : f32
    %23 = vector.broadcast %cst_6 : f32 to vector<32x1xf32>
    %24 = arith.addf %20, %23 : vector<32x1xf32>
    %25 = math.rsqrt %24 : vector<32x1xf32>
    %26 = vector.broadcast %25 : vector<32x1xf32> to vector<32x32xf32>
    %27 = arith.mulf %22, %26 : vector<32x32xf32>
    %28 = vector.broadcast %1 : vector<1x32xf32> to vector<32x32xf32>
    %29 = arith.mulf %27, %28 : vector<32x32xf32>
    %30 = vector.broadcast %2 : vector<1x32xf32> to vector<32x32xf32>
    %31 = arith.addf %29, %30 : vector<32x32xf32>
    %c0_7 = arith.constant 0 : index
    %c0_8 = arith.constant 0 : index
    %32 = vector.load %arg3[%c0_7, %c0_8] : memref<32x96xbf16, #tpu.memory_space<vmem>>, vector<32x96xbf16>
    %33 = arith.truncf %31 : vector<32x32xf32> to vector<32x32xbf16>
    %cst_9 = arith.constant dense<0.000000e+00> : vector<32x96xf32>
    %34 = tpu.matmul %33, %32, %cst_9 {dimension_numbers = #tpu.dot_dimension_numbers<[1], [0], [0], [1], [0, 0, 1, 1], [], []>} : vector<32x32xbf16>, vector<32x96xbf16>, vector<32x96xf32> -> vector<32x96xf32>
    %35 = vector.broadcast %3 : vector<1x96xf32> to vector<32x96xf32>
    %36 = arith.addf %34, %35 : vector<32x96xf32>
    %37 = vector.extract_strided_slice %36 {offsets = [0, 0], sizes = [32, 32], strides = [1, 1]} : vector<32x96xf32> to vector<32x32xf32>
    %38 = vector.shape_cast %37 : vector<32x32xf32> to vector<4x8x32xf32>
    %39 = arith.truncf %38 : vector<4x8x32xf32> to vector<4x8x32xbf16>
    %40 = vector.extract_strided_slice %36 {offsets = [0, 32], sizes = [32, 32], strides = [1, 1]} : vector<32x96xf32> to vector<32x32xf32>
    %41 = vector.shape_cast %40 : vector<32x32xf32> to vector<4x8x32xf32>
    %42 = arith.truncf %41 : vector<4x8x32xf32> to vector<4x8x32xbf16>
    %43 = vector.extract_strided_slice %36 {offsets = [0, 64], sizes = [32, 32], strides = [1, 1]} : vector<32x96xf32> to vector<32x32xf32>
    %44 = vector.shape_cast %43 : vector<32x32xf32> to vector<4x8x32xf32>
    %45 = arith.truncf %44 : vector<4x8x32xf32> to vector<4x8x32xbf16>
    %46 = vector.extract_strided_slice %39 {offsets = [0, 0, 0], sizes = [4, 8, 8], strides = [1, 1, 1]} : vector<4x8x32xbf16> to vector<4x8x8xbf16>
    %47 = vector.extract_strided_slice %39 {offsets = [0, 0, 8], sizes = [4, 8, 8], strides = [1, 1, 1]} : vector<4x8x32xbf16> to vector<4x8x8xbf16>
    %48 = vector.extract_strided_slice %39 {offsets = [0, 0, 16], sizes = [4, 8, 8], strides = [1, 1, 1]} : vector<4x8x32xbf16> to vector<4x8x8xbf16>
    %49 = vector.extract_strided_slice %39 {offsets = [0, 0, 24], sizes = [4, 8, 8], strides = [1, 1, 1]} : vector<4x8x32xbf16> to vector<4x8x8xbf16>
    %50 = tpu.concatenate %46, %47, %48, %49 in 0 : vector<4x8x8xbf16>, vector<4x8x8xbf16>, vector<4x8x8xbf16>, vector<4x8x8xbf16> -> vector<16x8x8xbf16>
    %51 = vector.extract_strided_slice %42 {offsets = [0, 0, 0], sizes = [4, 8, 8], strides = [1, 1, 1]} : vector<4x8x32xbf16> to vector<4x8x8xbf16>
    %52 = vector.extract_strided_slice %42 {offsets = [0, 0, 8], sizes = [4, 8, 8], strides = [1, 1, 1]} : vector<4x8x32xbf16> to vector<4x8x8xbf16>
    %53 = vector.extract_strided_slice %42 {offsets = [0, 0, 16], sizes = [4, 8, 8], strides = [1, 1, 1]} : vector<4x8x32xbf16> to vector<4x8x8xbf16>
    %54 = vector.extract_strided_slice %42 {offsets = [0, 0, 24], sizes = [4, 8, 8], strides = [1, 1, 1]} : vector<4x8x32xbf16> to vector<4x8x8xbf16>
    %55 = tpu.concatenate %51, %52, %53, %54 in 0 : vector<4x8x8xbf16>, vector<4x8x8xbf16>, vector<4x8x8xbf16>, vector<4x8x8xbf16> -> vector<16x8x8xbf16>
    %56 = vector.extract_strided_slice %45 {offsets = [0, 0, 0], sizes = [4, 8, 8], strides = [1, 1, 1]} : vector<4x8x32xbf16> to vector<4x8x8xbf16>
    %57 = vector.extract_strided_slice %45 {offsets = [0, 0, 8], sizes = [4, 8, 8], strides = [1, 1, 1]} : vector<4x8x32xbf16> to vector<4x8x8xbf16>
    %58 = vector.extract_strided_slice %45 {offsets = [0, 0, 16], sizes = [4, 8, 8], strides = [1, 1, 1]} : vector<4x8x32xbf16> to vector<4x8x8xbf16>
    %59 = vector.extract_strided_slice %45 {offsets = [0, 0, 24], sizes = [4, 8, 8], strides = [1, 1, 1]} : vector<4x8x32xbf16> to vector<4x8x8xbf16>
    %60 = tpu.concatenate %56, %57, %58, %59 in 0 : vector<4x8x8xbf16>, vector<4x8x8xbf16>, vector<4x8x8xbf16>, vector<4x8x8xbf16> -> vector<16x8x8xbf16>
    "tpu.trace_start"() <{level = 10 : i32, message = "bqd,bkd->bqk"}> : () -> ()
    %cst_10 = arith.constant dense<0.000000e+00> : vector<16x8x8xf32>
    %61 = tpu.matmul %50, %55, %cst_10 {dimension_numbers = #tpu.dot_dimension_numbers<[2], [2], [1], [1], [0, 0, 0, 1, 1, 1], [0], [0]>} : vector<16x8x8xbf16>, vector<16x8x8xbf16>, vector<16x8x8xf32> -> vector<16x8x8xf32>
    "tpu.trace_stop"() : () -> ()
    %cst_11 = arith.constant dense<0xFF800000> : vector<16x8xf32>
    %62 = vector.multi_reduction <maximumf>, %61, %cst_11 [2] : vector<16x8x8xf32> to vector<16x8xf32>
    %63 = vector.shape_cast %62 : vector<16x8xf32> to vector<16x8x1xf32>
    %64 = vector.broadcast %63 : vector<16x8x1xf32> to vector<16x8x8xf32>
    %65 = arith.subf %61, %64 : vector<16x8x8xf32>
    %66 = math.exp %65 : vector<16x8x8xf32>
    %cst_12 = arith.constant dense<0.000000e+00> : vector<16x8xf32>
    %67 = vector.multi_reduction <add>, %66, %cst_12 [2] : vector<16x8x8xf32> to vector<16x8xf32>
    %68 = vector.shape_cast %67 : vector<16x8xf32> to vector<16x8x1xf32>
    %69 = tpu.reciprocal %68 {approx = true} : vector<16x8x1xf32> -> vector<16x8x1xf32>
    %70 = vector.broadcast %69 : vector<16x8x1xf32> to vector<16x8x8xf32>
    %71 = arith.mulf %66, %70 : vector<16x8x8xf32>
    %72 = arith.truncf %71 : vector<16x8x8xf32> to vector<16x8x8xbf16>
    "tpu.trace_start"() <{level = 10 : i32, message = "bqk,bkd->bqd"}> : () -> ()
    %cst_13 = arith.constant dense<0.000000e+00> : vector<16x8x8xf32>
    %73 = tpu.matmul %72, %60, %cst_13 {dimension_numbers = #tpu.dot_dimension_numbers<[2], [1], [1], [2], [0, 0, 0, 1, 1, 2], [0], [0]>} : vector<16x8x8xbf16>, vector<16x8x8xbf16>, vector<16x8x8xf32> -> vector<16x8x8xf32>
    "tpu.trace_stop"() : () -> ()
    %74 = vector.shape_cast %73 : vector<16x8x8xf32> to vector<128x8xf32>
    %75 = arith.truncf %74 : vector<128x8xf32> to vector<128x8xbf16>
    %c0_14 = arith.constant 0 : index
    %c0_15 = arith.constant 0 : index
    %c0_16 = arith.constant 0 : index
    %76 = vector.load %arg7[%c0_14, %c0_15, %c0_16] : memref<4x32x128xbf16, #tpu.memory_space<vmem>>, vector<1x32x128xbf16>
    %77 = vector.shape_cast %76 : vector<1x32x128xbf16> to vector<32x128xbf16>
    %cst_17 = arith.constant dense<0.000000e+00> : vector<32x8xf32>
    %78 = tpu.matmul %77, %75, %cst_17 {dimension_numbers = #tpu.dot_dimension_numbers<[1], [0], [0], [1], [0, 0, 1, 1], [], []>} : vector<32x128xbf16>, vector<128x8xbf16>, vector<32x8xf32> -> vector<32x8xf32>
    %c1 = arith.constant 1 : index
    %c0_18 = arith.constant 0 : index
    %c0_19 = arith.constant 0 : index
    %79 = vector.load %arg7[%c1, %c0_18, %c0_19] : memref<4x32x128xbf16, #tpu.memory_space<vmem>>, vector<1x32x128xbf16>
    %80 = vector.shape_cast %79 : vector<1x32x128xbf16> to vector<32x128xbf16>
    %cst_20 = arith.constant dense<0.000000e+00> : vector<32x8xf32>
    %81 = tpu.matmul %80, %75, %cst_20 {dimension_numbers = #tpu.dot_dimension_numbers<[1], [0], [0], [1], [0, 0, 1, 1], [], []>} : vector<32x128xbf16>, vector<128x8xbf16>, vector<32x8xf32> -> vector<32x8xf32>
    %c2 = arith.constant 2 : index
    %c0_21 = arith.constant 0 : index
    %c0_22 = arith.constant 0 : index
    %82 = vector.load %arg7[%c2, %c0_21, %c0_22] : memref<4x32x128xbf16, #tpu.memory_space<vmem>>, vector<1x32x128xbf16>
    %83 = vector.shape_cast %82 : vector<1x32x128xbf16> to vector<32x128xbf16>
    %cst_23 = arith.constant dense<0.000000e+00> : vector<32x8xf32>
    %84 = tpu.matmul %83, %75, %cst_23 {dimension_numbers = #tpu.dot_dimension_numbers<[1], [0], [0], [1], [0, 0, 1, 1], [], []>} : vector<32x128xbf16>, vector<128x8xbf16>, vector<32x8xf32> -> vector<32x8xf32>
    %c3 = arith.constant 3 : index
    %c0_24 = arith.constant 0 : index
    %c0_25 = arith.constant 0 : index
    %85 = vector.load %arg7[%c3, %c0_24, %c0_25] : memref<4x32x128xbf16, #tpu.memory_space<vmem>>, vector<1x32x128xbf16>
    %86 = vector.shape_cast %85 : vector<1x32x128xbf16> to vector<32x128xbf16>
    %cst_26 = arith.constant dense<0.000000e+00> : vector<32x8xf32>
    %87 = tpu.matmul %86, %75, %cst_26 {dimension_numbers = #tpu.dot_dimension_numbers<[1], [0], [0], [1], [0, 0, 1, 1], [], []>} : vector<32x128xbf16>, vector<128x8xbf16>, vector<32x8xf32> -> vector<32x8xf32>
    %88 = tpu.concatenate %78, %81, %84, %87 in 1 : vector<32x8xf32>, vector<32x8xf32>, vector<32x8xf32>, vector<32x8xf32> -> vector<32x32xf32>
    %c0_27 = arith.constant 0 : index
    %c0_28 = arith.constant 0 : index
    %89 = vector.load %arg4[%c0_27, %c0_28] : memref<32x32xbf16, #tpu.memory_space<vmem>>, vector<32x32xbf16>
    %90 = arith.truncf %88 : vector<32x32xf32> to vector<32x32xbf16>
    %cst_29 = arith.constant dense<0.000000e+00> : vector<32x32xf32>
    %91 = tpu.matmul %90, %89, %cst_29 {dimension_numbers = #tpu.dot_dimension_numbers<[1], [0], [0], [1], [0, 0, 1, 1], [], []>} : vector<32x32xbf16>, vector<32x32xbf16>, vector<32x32xf32> -> vector<32x32xf32>
    %92 = vector.broadcast %4 : vector<1x32xf32> to vector<32x32xf32>
    %93 = arith.addf %91, %92 : vector<32x32xf32>
    %94 = arith.addf %93, %9 : vector<32x32xf32>
    %cst_30 = arith.constant dense<0.000000e+00> : vector<32xf32>
    %95 = vector.multi_reduction <add>, %94, %cst_30 [1] : vector<32x32xf32> to vector<32xf32>
    %96 = vector.shape_cast %95 : vector<32xf32> to vector<32x1xf32>
    %cst_31 = arith.constant 3.200000e+01 : f32
    %97 = vector.broadcast %cst_31 : f32 to vector<32x1xf32>
    %98 = arith.divf %96, %97 : vector<32x1xf32>
    %99 = vector.broadcast %98 : vector<32x1xf32> to vector<32x32xf32>
    %100 = arith.subf %94, %99 : vector<32x32xf32>
    %101 = arith.mulf %100, %100 : vector<32x32xf32>
    %cst_32 = arith.constant dense<0.000000e+00> : vector<32xf32>
    %102 = vector.multi_reduction <add>, %101, %cst_32 [1] : vector<32x32xf32> to vector<32xf32>
    %103 = vector.shape_cast %102 : vector<32xf32> to vector<32x1xf32>
    %cst_33 = arith.constant 3.200000e+01 : f32
    %104 = vector.broadcast %cst_33 : f32 to vector<32x1xf32>
    %105 = arith.divf %103, %104 : vector<32x1xf32>
    %106 = vector.broadcast %98 : vector<32x1xf32> to vector<32x32xf32>
    %107 = arith.subf %94, %106 : vector<32x32xf32>
    %cst_34 = arith.constant 9.99999974E-6 : f32
    %108 = vector.broadcast %cst_34 : f32 to vector<32x1xf32>
    %109 = arith.addf %105, %108 : vector<32x1xf32>
    %110 = math.rsqrt %109 : vector<32x1xf32>
    %111 = vector.broadcast %110 : vector<32x1xf32> to vector<32x32xf32>
    %112 = arith.mulf %107, %111 : vector<32x32xf32>
    %113 = vector.broadcast %5 : vector<1x32xf32> to vector<32x32xf32>
    %114 = arith.mulf %112, %113 : vector<32x32xf32>
    %115 = vector.broadcast %6 : vector<1x32xf32> to vector<32x32xf32>
    %116 = arith.addf %114, %115 : vector<32x32xf32>
    %c0_35 = arith.constant 0 : index
    %c0_36 = arith.constant 0 : index
    %117 = vector.load %arg5[%c0_35, %c0_36] : memref<32x128xbf16, #tpu.memory_space<vmem>>, vector<32x128xbf16>
    %118 = arith.truncf %116 : vector<32x32xf32> to vector<32x32xbf16>
    %cst_37 = arith.constant dense<0.000000e+00> : vector<32x128xf32>
    %119 = tpu.matmul %118, %117, %cst_37 {dimension_numbers = #tpu.dot_dimension_numbers<[1], [0], [0], [1], [0, 0, 1, 1], [], []>} : vector<32x32xbf16>, vector<32x128xbf16>, vector<32x128xf32> -> vector<32x128xf32>
    %120 = vector.broadcast %7 : vector<1x128xf32> to vector<32x128xf32>
    %121 = arith.addf %119, %120 : vector<32x128xf32>
    %cst_38 = arith.constant 0.000000e+00 : f32
    %122 = vector.broadcast %cst_38 : f32 to vector<32x128xf32>
    %123 = arith.cmpf oge, %121, %122 : vector<32x128xf32>
    %cst_39 = arith.constant 0.00999999977 : f32
    %124 = vector.broadcast %cst_39 : f32 to vector<32x128xf32>
    %125 = arith.mulf %124, %121 : vector<32x128xf32>
    %126 = arith.select %123, %121, %125 : vector<32x128xi1>, vector<32x128xf32>
    %c0_40 = arith.constant 0 : index
    %c0_41 = arith.constant 0 : index
    %127 = vector.load %arg6[%c0_40, %c0_41] : memref<128x32xbf16, #tpu.memory_space<vmem>>, vector<128x32xbf16>
    %128 = arith.truncf %126 : vector<32x128xf32> to vector<32x128xbf16>
    %cst_42 = arith.constant dense<0.000000e+00> : vector<32x32xf32>
    %129 = tpu.matmul %128, %127, %cst_42 {dimension_numbers = #tpu.dot_dimension_numbers<[1], [0], [0], [1], [0, 0, 1, 1], [], []>} : vector<32x128xbf16>, vector<128x32xbf16>, vector<32x32xf32> -> vector<32x32xf32>
    %130 = vector.broadcast %8 : vector<1x32xf32> to vector<32x32xf32>
    %131 = arith.addf %129, %130 : vector<32x32xf32>
    %132 = arith.addf %131, %94 : vector<32x32xf32>
    %c0_43 = arith.constant 0 : index
    %c0_44 = arith.constant 0 : index
    %133 = vector.load %arg8[%c0_43, %c0_44] : memref<32x32xf32, #tpu.memory_space<vmem>>, vector<32x32xf32>
    tpu.vector_store %arg8[%c0_43, %c0_44], %132 {strides = array<i32>} : memref<32x32xf32, #tpu.memory_space<vmem>>, vector<32x32xf32>,
    return
  }
  func.func @transform_0(%arg0: i32) -> (i32, i32) {
    %c0_i32 = arith.constant 0 : i32
    %c0_i32_0 = arith.constant 0 : i32
    return %arg0, %c0_i32 : i32, i32
  }
  func.func @transform_1(%arg0: i32) -> (i32, i32) {
    %c0_i32 = arith.constant 0 : i32
    %c0_i32_0 = arith.constant 0 : i32
    %c0_i32_1 = arith.constant 0 : i32
    return %c0_i32, %c0_i32_0 : i32, i32
  }
  func.func @transform_2(%arg0: i32) -> (i32, i32) {
    %c0_i32 = arith.constant 0 : i32
    %c0_i32_0 = arith.constant 0 : i32
    %c0_i32_1 = arith.constant 0 : i32
    return %c0_i32, %c0_i32_0 : i32, i32
  }
  func.func @transform_3(%arg0: i32) -> (i32, i32) {
    %c0_i32 = arith.constant 0 : i32
    %c0_i32_0 = arith.constant 0 : i32
    %c0_i32_1 = arith.constant 0 : i32
    return %c0_i32, %c0_i32_0 : i32, i32
  }
  func.func @transform_4(%arg0: i32) -> (i32, i32) {
    %c0_i32 = arith.constant 0 : i32
    %c0_i32_0 = arith.constant 0 : i32
    %c0_i32_1 = arith.constant 0 : i32
    return %c0_i32, %c0_i32_0 : i32, i32
  }
  func.func @transform_5(%arg0: i32) -> (i32, i32) {
    %c0_i32 = arith.constant 0 : i32
    %c0_i32_0 = arith.constant 0 : i32
    %c0_i32_1 = arith.constant 0 : i32
    return %c0_i32, %c0_i32_0 : i32, i32
  }
  func.func @transform_6(%arg0: i32) -> (i32, i32, i32) {
    %c0_i32 = arith.constant 0 : i32
    %c0_i32_0 = arith.constant 0 : i32
    %c0_i32_1 = arith.constant 0 : i32
    %c0_i32_2 = arith.constant 0 : i32
    return %c0_i32, %c0_i32_0, %c0_i32_1 : i32, i32, i32
  }
  func.func @transform_7(%arg0: i32) -> (i32, i32) {
    %c0_i32 = arith.constant 0 : i32
    %c0_i32_0 = arith.constant 0 : i32
    return %arg0, %c0_i32 : i32, i32
  }
}

</mosaic_0001>

<bundles_post_ra>
// kernel: tpu_custom_call.1
= control target key start
LH: loop header
LB: loop body
LE: loop exit
PB: predicated region body
PF: predicated region fallthrough
CT: control target
= control target key end

     0   :  { %12 = vsyncpa [#allocation3], 0  ;;  %s4308_s0 = inlined_call_operand.vmem [shape: f32[32,32], index: 0, kind: input, shape index: {}]   ;;  %s4309_s1 = inlined_call_operand.hbm [shape: f32[8,128], index: 1, kind: input, shape index: {}]   ;;  %s4310_s2 = inlined_call_operand.hbm [shape: bf16[32,96], index: 2, kind: input, shape index: {}]   ;;  %s4311_s3 = inlined_call_operand.hbm [shape: bf16[32,32], index: 3, kind: input, shape index: {}]   ;;  %s4312_s4 = inlined_call_operand.hbm [shape: bf16[32,128], index: 4, kind: input, shape index: {}]   ;;  %s4313_s5 = inlined_call_operand.vmem [shape: bf16[128,32], index: 5, kind: input, shape index: {}]   ;;  %s4314_s6 = inlined_call_operand.vmem [shape: bf16[4,32,128], index: 6, kind: input, shape index: {}]   ;;  %s4315_s7 = inlined_call_operand.hbm [shape: f32[32,32], index: 7, kind: output, shape index: {}]  }
   0x1   :  { %13 = vsyncpa [#allocation6], 0 }
   0x2   :  { %14 = vsyncpa [#allocation9], 0 }
   0x3   :  { %15 = vsyncpa [#allocation4], 0  ;;  %s3498_s24 = smov [#allocation5]   ;;  %s3380_s28 = scalar_lea.hbm %s4310_s2, 256 }
   0x4   :  { %s33_s25 = sshll.u32 %s3498_s24, 4  ;;  %p3381_p0 = scmp.ne.s32.totalorder %s4310_s2, %s3380_s28  ;;  %s34_s25 = int_to_ptr.vmem [resolvable:$true] %s33_s25 }
   0x5   :  { %p3384_p1 = scmp.lt.u32.totalorder %s3380_s28, %s4310_s2 }
   0x7   :  { %p3386_p2 = pnand %p3384_p1, %p3381_p0 }
   0x9   :  { %3389 = shalt.err (!%p3386_p2)
}
   0xa   :  { %s3390_s10 = scalar_lea.vmem %s34_s25, 256  ;;  %p3395_p4 = scmp.lt.s32.totalorder %s34_s25, %s34_s25 }
   0xb   :  { %p3391_p3 = scmp.ne.s32.totalorder %s34_s25, %s3390_s10  ;;  %p3396_p5 = scmp.lt.s32.totalorder %s3390_s10, %s3390_s10 }
   0xd   :  { %p3397_p6 = por %p3396_p5, %p3395_p4 }
   0xf   :  { %p3398_p7 = pnand %p3397_p6, %p3391_p3 }
  0x11   :  { %3401 = shalt.err (!%p3398_p7)
}
  0x12   :  { %s3499_s11 = smov 64   ;;  %s3500_s12 = smov 4  }
  0x13   :  { %39 = dma.hbm_to_vmem [thread:$0]  %s4310_s2, 256, %s34_s25, [#allocation6], %s3499_s11, %s3499_s11, %s3500_s12  }
  0x14   :  { %s3501_s15 = smov [#allocation2]   ;;  %s3502_s17 = smov [#allocation7]  }
  0x15   :  { %s24_s16 = sshll.u32 %s3501_s15, 4  ;;  %s45_s18 = sshll.u32 %s3502_s17, 4  ;;  %s25_s16 = int_to_ptr.vmem [resolvable:$true] %s24_s16  ;;  %s46_s18 = int_to_ptr.vmem [resolvable:$true] %s45_s18 }
  0x16   :  { %s3402_s21 = scalar_lea.hbm %s4309_s1, 128 }
  0x17   :  { %p3403_p8 = scmp.ne.s32.totalorder %s4309_s1, %s3402_s21  ;;  %p3406_p9 = scmp.lt.u32.totalorder %s3402_s21, %s4309_s1 }
  0x19   :  { %p3408_p10 = pnand %p3406_p9, %p3403_p8 }
  0x1b   :  { %3411 = shalt.err (!%p3408_p10)
}
  0x1c   :  { %s3412_s2 = scalar_lea.vmem %s25_s16, 128  ;;  %p3417_p12 = scmp.lt.s32.totalorder %s25_s16, %s25_s16 }
  0x1d   :  { %p3413_p11 = scmp.ne.s32.totalorder %s25_s16, %s3412_s2  ;;  %p3418_p13 = scmp.lt.s32.totalorder %s3412_s2, %s3412_s2 }
  0x1f   :  { %p3419_p0 = por %p3418_p13, %p3417_p12 }
  0x21   :  { %p3420_p1 = pnand %p3419_p0, %p3413_p11 }
  0x23   :  { %3423 = shalt.err (!%p3420_p1)
}
  0x24   :  { %27 = dma.hbm_to_vmem [thread:$0]  %s4309_s1, 128, %s25_s16, [#allocation3]  }
  0x25   :  { %s3424_s30 = scalar_lea.hbm %s4311_s3, 256 }
  0x26   :  { %p3425_p2 = scmp.ne.s32.totalorder %s4311_s3, %s3424_s30  ;;  %p3428_p3 = scmp.lt.u32.totalorder %s3424_s30, %s4311_s3 }
  0x28   :  { %p3430_p4 = pnand %p3428_p3, %p3425_p2 }
  0x2a   :  { %3433 = shalt.err (!%p3430_p4)
}
  0x2b   :  { %s3434_s14 = scalar_lea.vmem %s46_s18, 256  ;;  %p3439_p6 = scmp.lt.s32.totalorder %s46_s18, %s46_s18 }
  0x2c   :  { %p3435_p5 = scmp.ne.s32.totalorder %s46_s18, %s3434_s14  ;;  %p3440_p7 = scmp.lt.s32.totalorder %s3434_s14, %s3434_s14 }
  0x2e   :  { %p3441_p8 = por %p3440_p7, %p3439_p6 }
  0x30   :  { %p3442_p9 = pnand %p3441_p8, %p3435_p5 }
  0x32   :  { %3445 = shalt.err (!%p3442_p9)
}
  0x33   :  { %51 = dma.hbm_to_vmem [thread:$0]  %s4311_s3, 256, %s46_s18, [#allocation6], %s3499_s11, %s3499_s11, %s3500_s12  }
  0x34   :  { %s3503_s16 = smov [#allocation8]   ;;  %s3446_s21 = scalar_lea.hbm %s4312_s4, 256 }
  0x35   :  { %s57_s17 = sshll.u32 %s3503_s16, 4  ;;  %p3447_p10 = scmp.ne.s32.totalorder %s4312_s4, %s3446_s21  ;;  %s58_s17 = int_to_ptr.vmem [resolvable:$true] %s57_s17 }
  0x36   :  { %p3450_p11 = scmp.lt.u32.totalorder %s3446_s21, %s4312_s4 }
  0x38   :  { %p3452_p12 = pnand %p3450_p11, %p3447_p10 }
  0x3a   :  { %3455 = shalt.err (!%p3452_p12)
}
  0x3b   :  { %s3456_s2 = scalar_lea.vmem %s58_s17, 256  ;;  %p3461_p0 = scmp.lt.s32.totalorder %s58_s17, %s58_s17 }
  0x3c   :  { %p3457_p13 = scmp.ne.s32.totalorder %s58_s17, %s3456_s2  ;;  %p3462_p1 = scmp.lt.s32.totalorder %s3456_s2, %s3456_s2 }
  0x3e   :  { %p3463_p2 = por %p3462_p1, %p3461_p0 }
  0x40   :  { %p3464_p3 = pnand %p3463_p2, %p3457_p13 }
  0x42   :  { %3467 = shalt.err (!%p3464_p3)
}
  0x43   :  { %63 = dma.hbm_to_vmem [thread:$0]  %s4312_s4, 256, %s58_s17, [#allocation9], %s3499_s11, %s3499_s11, %s3500_s12  }
  0x44   :  { %3490 = dma.done.wait [#allocation3], 128  }
  0x45   :  { %3491 = vsyncadd [#allocation3], 4294967168 }
  0x46   :  { %3492 = dma.done.wait [#allocation6], 512  }
  0x47   :  { %3493 = vsyncadd [#allocation6], 4294966784 }
  0x48   :  { %3494 = dma.done.wait [#allocation9], 256  }
  0x49   :  { %3495 = vsyncadd [#allocation9], 4294967040  ;;  %vm86_vm0 = vcmask 261120   ;;  %v82_v0 = vld [vmem:[%s4308_s0] sm:$0xff]  ;;  %v84_v1 = vld [vmem:[%s4308_s0 + $0x10] sm:$0xff]  ;;  %v140_v35 = vlaneseq  ;;  %s3504_s9 = smov 120  }
  0x4a   :  { %v83_v2 = vld [vmem:[%s4308_s0 + $0x8] sm:$0xff]  ;;  %v87_v3 = vsel %vm86_vm0, %v82_v0, 0.0  ;;  %v93_v4 = vsel %vm86_vm0, %v84_v1, 0.0  ;;  %v85_v5 = vld [vmem:[%s4308_s0 + $0x18] sm:$0xff]  ;;  %v3274_v29 = vld [vmem:[#allocation5 + $0x8] sm:$0xff]   ;;  %s3505_s10 = smov 112  }
  0x4b   :  { %88 = vadd.xlane.f32.xlu0 %v87_v3  ;;  %94 = vadd.xlane.f32.xlu1 %v93_v4  ;;  %v90_v6 = vsel %vm86_vm0, %v83_v2, 0.0  ;;  %v96_v7 = vsel %vm86_vm0, %v85_v5, 0.0  ;;  %v3273_v28 = vld [vmem:[#allocation5] sm:$0xff]   ;;  %v3632_v41 = vshrl.u32 %v140_v35, 7  ;;  %v81_v45 = vld [vmem:[#allocation2] sm:$0xff]  ;;  %vm3507_vm1 = vmmov 0  }
  0x4c   :  { %2910 = vmatprep.subr.bf16.mxu0 %v3273_v28  ;;  %s3508_s13 = smov 104   ;;  %s3509_s14 = smov 96   ;;  %vm267_vm2 = vcmask 64512   ;;  %vm1231_vm3 = vcmask 1043456   ;;  %vm2318_vm4 = vcmask 130048   ;;  %vm2323_vm5 = vcmask 195584  }
  0x4d   :  { %2911 = vmatpush3.bf16.msra.mxu0 %v3273_v28  ;;  %v142_v44 = vsub.s32 0, %v3632_v41  ;;  %v150_v49 = vsub.s32 1, %v3632_v41  ;;  %v164_v3 = vsub.s32 2, %v3632_v41  ;;  %s3510_s27 = smov 8   ;;  %s3512_s28 = smov 24  }
  0x4e   :  { %2912 = vmatprep.subr.bf16.mxu0 %v3274_v29 }
  0x4f   :  { %91 = vadd.xlane.f32.xlu0 %v90_v6  ;;  %97 = vadd.xlane.f32.xlu1 %v96_v7  ;;  %v143_v48 = vrot.slane %v81_v45, %v142_v44  ;;  %v151_v54 = vrot.slane %v81_v45, %v150_v49  ;;  %v165_v4 = vrot.slane %v81_v45, %v164_v3 }
  0x51   :  { %2913 = vmatpush3.bf16.msra.mxu0 %v3274_v29 }
  0xd8   :  { %v89_v8 = vpop.xlane.xlu0 %88  ;;  %v95_v9 = vpop.xlane.xlu1 %94 }
  0xd9   :  { %v100_v10 = vmul.f32 0.03125, %v89_v8  ;;  %v102_v11 = vmul.f32 0.03125, %v95_v9 }
  0xdb   :  { %v104_v12 = vsub.f32 %v82_v0, %v100_v10  ;;  %v106_v13 = vsub.f32 %v84_v1, %v102_v11 }
  0xdc   :  { %v92_v14 = vpop.xlane.xlu0 %91  ;;  %v98_v15 = vpop.xlane.xlu1 %97 }
  0xdd   :  { %v101_v16 = vmul.f32 0.03125, %v92_v14  ;;  %v103_v17 = vmul.f32 0.03125, %v98_v15  ;;  %v108_v18 = vmul.f32 %v104_v12, %v104_v12  ;;  %v110_v19 = vmul.f32 %v106_v13, %v106_v13 }
  0xdf   :  { %v105_v20 = vsub.f32 %v83_v2, %v101_v16  ;;  %v107_v21 = vsub.f32 %v85_v5, %v103_v17  ;;  %v112_v22 = vsel %vm86_vm0, %v108_v18, 0.0  ;;  %v118_v23 = vsel %vm86_vm0, %v110_v19, 0.0 }
  0xe0   :  { %113 = vadd.xlane.f32.xlu0 %v112_v22  ;;  %v3506_v16 = vmov 0.0  }
  0xe1   :  { %v109_v24 = vmul.f32 %v105_v20, %v105_v20  ;;  %v111_v25 = vmul.f32 %v107_v21, %v107_v21  ;;  %2918 = vmatprep.subr.bf16.mxu0 %v3506_v16  ;;  %2930 = vmatprep.subr.bf16.mxu1 %v3506_v16 }
  0xe2   :  { %2932 = vmatprep.mubr.msk.bf16.mxu1 %vm3507_vm1, %v3506_v16 }
  0xe3   :  { %v115_v26 = vsel %vm86_vm0, %v109_v24, 0.0  ;;  %v121_v27 = vsel %vm86_vm0, %v111_v25, 0.0 }
  0xe4   :  { %119 = vadd.xlane.f32.xlu0 %v118_v23  ;;  %116 = vadd.xlane.f32.xlu1 %v115_v26 }
  0xe8   :  { %122 = vadd.xlane.f32.xlu1 %v121_v27 }
 0x16d   :  { %v114_v30 = vpop.xlane.xlu0 %113 }
 0x16e   :  { %v124_v31 = vmul.f32 0.03125, %v114_v30 }
 0x170   :  { %v128_v32 = vadd.f32 1e-05, %v124_v31 }
 0x171   :  { %v117_v33 = vpop.xlane.xlu1 %116  ;;  %v120_v34 = vpop.xlane.xlu0 %119 }
 0x172   :  { %3295 = vrsqrt.f32 %v128_v32  ;;  %v125_v36 = vmul.f32 0.03125, %v117_v33  ;;  %v126_v37 = vmul.f32 0.03125, %v120_v34 }
 0x174   :  { %v129_v38 = vadd.f32 1e-05, %v125_v36  ;;  %v130_v39 = vadd.f32 1e-05, %v126_v37 }
 0x175   :  { %v123_v40 = vpop.xlane.xlu1 %122 }
 0x176   :  { %3297 = vrsqrt.f32 %v129_v38  ;;  %v127_v42 = vmul.f32 0.03125, %v123_v40 }
 0x177   :  { %3299 = vrsqrt.f32 %v130_v39 }
 0x178   :  { %v131_v43 = vadd.f32 1e-05, %v127_v42 }
 0x17a   :  { %3301 = vrsqrt.f32 %v131_v43 }
 0x17c   :  { %v3296_v46 = vpop.eup %3295 }
 0x17d   :  { %v136_v47 = vmul.f32 %v3296_v46, %v104_v12 }
 0x17f   :  { %v144_v53 = vmul.f32 %v143_v48, %v136_v47 }
 0x180   :  { %v3298_v50 = vpop.eup %3297 }
 0x181   :  { %v3300_v51 = vpop.eup %3299  ;;  %v137_v52 = vmul.f32 %v3298_v50, %v105_v20  ;;  %v152_v59 = vadd.f32 %v151_v54, %v144_v53 }
 0x182   :  { %v138_v55 = vmul.f32 %v3300_v51, %v106_v13 }
 0x183   :  { %v145_v56 = vmul.f32 %v143_v48, %v137_v52 }
 0x184   :  { %v3302_v57 = vpop.eup %3301  ;;  %v146_v61 = vmul.f32 %v143_v48, %v138_v55 }
 0x185   :  { %v139_v58 = vmul.f32 %v3302_v57, %v107_v21  ;;  %v153_v60 = vadd.f32 %v151_v54, %v145_v56 }
 0x186   :  { %v154_v0 = vadd.f32 %v151_v54, %v146_v61 }
 0x187   :  { %v160_v62 = vpack.c.bf16 %v153_v60, %v152_v59  ;;  %v147_v63 = vmul.f32 %v143_v48, %v139_v58 }
 0x189   :  { %2914 = vmatprep.mubr.msk.bf16.mxu0 %vm86_vm0, %v160_v62  ;;  %v155_v1 = vadd.f32 %v151_v54, %v147_v63 }
 0x18b   :  { %v161_v2 = vpack.c.bf16 %v155_v1, %v154_v0 }
 0x18d   :  { %2915 = vmatmul.mubr.msk.bf16.vlgmr.msra.gmra.mrb[0].mxu0 %vm86_vm0, %v161_v2 }
 0x18e   :  { %2920 = vmatprep.mubr.msk.bf16.mxu0 %vm3507_vm1, %v3506_v16 }
 0x260   :  { %v2916_v5 = vpop.f32.mrb[0].mxu0 }
 0x261   :  { %v218_v6 = vpop.f32.mrb[1].mxu0  ;;  %v227_v12 = vadd.f32 %v2916_v5, %v165_v4 }
 0x262   :  { %v219_v7 = vadd.f32 %v218_v6, %v165_v4  ;;  %v2917_v8 = vpop.f32.mrb[2].mxu0 }
 0x263   :  { %v221_v9 = vpop.f32.mrb[3].mxu0  ;;  %v3645_v14 = vpack.c.bf16 %v227_v12, %v227_v12  ;;  %v230_v15 = vadd.f32 %v2917_v8, %v165_v4 }
 0x264   :  { %v3639_v10 = vpack.c.bf16 %v219_v7, %v219_v7  ;;  %v222_v11 = vadd.f32 %v221_v9, %v165_v4 }
 0x265   :  { %v3651_v17 = vpack.c.bf16 %v230_v15, %v230_v15 }
 0x266   :  { %v3641_v13 = vpack.c.bf16 %v222_v11, %v222_v11  ;;  %241 = vrot.lane.b32.xlu0 %v3639_v10, %s3504_s9 }
 0x268   :  { %243 = vrot.lane.b32.xlu1 %v3641_v13, %s3504_s9 }
 0x26a   :  { %249 = vrot.lane.b32.xlu0 %v3639_v10, %s3505_s10 }
 0x26c   :  { %245 = vrot.lane.b32.xlu1 %v3645_v14, %s3504_s9 }
 0x26e   :  { %253 = vrot.lane.b32.xlu0 %v3645_v14, %s3505_s10 }
 0x270   :  { %247 = vrot.lane.b32.xlu1 %v3651_v17, %s3504_s9 }
 0x272   :  { %257 = vrot.lane.b32.xlu0 %v3639_v10, %s3508_s13 }
 0x274   :  { %251 = vrot.lane.b32.xlu1 %v3641_v13, %s3505_s10 }
 0x276   :  { %265 = vrot.lane.b32.xlu0 %v3639_v10, %s3509_s14 }
 0x278   :  { %255 = vrot.lane.b32.xlu1 %v3651_v17, %s3505_s10 }
 0x27a   :  { %263 = vrot.lane.b32.xlu0 %v3651_v17, %s3508_s13 }
 0x27c   :  { %259 = vrot.lane.b32.xlu1 %v3641_v13, %s3508_s13 }
 0x27e   :  { %362 = vrot.lane.b32.xlu0 %v3645_v14, %s3509_s14 }
 0x280   :  { %261 = vrot.lane.b32.xlu1 %v3645_v14, %s3508_s13 }
 0x284   :  { %314 = vrot.lane.b32.xlu1 %v3641_v13, %s3509_s14 }
 0x288   :  { %410 = vrot.lane.b32.xlu1 %v3651_v17, %s3509_s14 }
 0x2d8   :  { %v3673_v18 = vpop.permute.xlu0 %241 }
 0x2d9   :  { %458 = vrot.lane.b32.xlu0 %v3673_v18, %s3509_s14 }
 0x2da   :  { %v3677_v19 = vpop.permute.xlu1 %243 }
 0x2db   :  { %506 = vrot.lane.b32.xlu1 %v3677_v19, %s3509_s14 }
 0x2dc   :  { %v3681_v20 = vpop.permute.xlu0 %249 }
 0x2de   :  { %v3683_v21 = vpop.permute.xlu1 %245 }
 0x2df   :  { %554 = vrot.lane.b32.xlu0 %v3683_v21, %s3509_s14 }
 0x2e0   :  { %v3687_v22 = vpop.permute.xlu0 %253 }
 0x2e2   :  { %v3689_v23 = vpop.permute.xlu1 %247 }
 0x2e3   :  { %602 = vrot.lane.b32.xlu1 %v3689_v23, %s3509_s14  ;;  %650 = vrot.lane.b32.xlu0 %v3681_v20, %s3509_s14 }
 0x2e4   :  { %v3695_v24 = vpop.permute.xlu0 %257 }
 0x2e6   :  { %v3697_v25 = vpop.permute.xlu1 %251 }
 0x2e7   :  { %698 = vrot.lane.b32.xlu1 %v3697_v25, %s3509_s14  ;;  %746 = vrot.lane.b32.xlu0 %v3687_v22, %s3509_s14 }
 0x2e8   :  { %v266_v26 = vpop.permute.xlu0 %265 }
 0x2e9   :  { %v272_v27 = vsel %vm267_vm2, %v266_v26, 0 }
 0x2ea   :  { %v3704_v28 = vpop.permute.xlu1 %255  ;;  %2919 = vmatpush3.bf16.xpose.msra.mxu0 %v272_v27 }
 0x2eb   :  { %794 = vrot.lane.b32.xlu1 %v3704_v28, %s3509_s14  ;;  %842 = vrot.lane.b32.xlu0 %v3695_v24, %s3509_s14 }
 0x2ec   :  { %v3710_v29 = vpop.permute.xlu0 %263  ;;  %2924 = vmatprep.subr.bf16.mxu0 %v3506_v16 }
 0x2ee   :  { %v3713_v30 = vpop.permute.xlu1 %259 }
 0x2ef   :  { %890 = vrot.lane.b32.xlu1 %v3713_v30, %s3509_s14 }
 0x2f0   :  { %v363_v31 = vpop.permute.xlu0 %362 }
 0x2f1   :  { %2921 = vmatmul.mubr.msk.bf16.vlgmr.msra.gmra.mrb[4].mxu0 %vm267_vm2, %v3639_v10  ;;  %v368_v32 = vsel %vm267_vm2, %v363_v31, 0 }
 0x2f2   :  { %v3720_v33 = vpop.permute.xlu1 %261  ;;  %2931 = vmatpush3.bf16.xpose.msra.mxu1 %v368_v32  ;;  %2926 = vmatprep.mubr.msk.bf16.mxu0 %vm3507_vm1, %v3506_v16 }
 0x2f3   :  { %938 = vrot.lane.b32.xlu0 %v3720_v33, %s3509_s14  ;;  %986 = vrot.lane.b32.xlu1 %v3710_v29, %s3509_s14 }
 0x2f4   :  { %2942 = vmatprep.subr.bf16.mxu1 %v3506_v16 }
 0x2f6   :  { %v315_v34 = vpop.permute.xlu1 %314 }
 0x2f7   :  { %v320_v35 = vsel %vm267_vm2, %v315_v34, 0  ;;  %1226 = vrot.lane.b32.xlu0 %v3639_v10, %s3499_s11  ;;  %1275 = vrot.lane.b32.xlu1 %v3641_v13, %s3499_s11 }
 0x2f8   :  { %2925 = vmatpush3.bf16.xpose.msra.mxu0 %v320_v35 }
 0x2f9   :  { %2933 = vmatmul.mubr.msk.bf16.vlgmr.msra.gmra.mrb[0].mxu1 %vm267_vm2, %v3645_v14  ;;  %2936 = vmatprep.subr.bf16.mxu0 %v3506_v16 }
 0x2fa   :  { %2944 = vmatprep.mubr.msk.bf16.mxu1 %vm3507_vm1, %v3506_v16  ;;  %v411_v36 = vpop.permute.xlu1 %410 }
 0x2fb   :  { %1323 = vrot.lane.b32.xlu0 %v3645_v14, %s3499_s11  ;;  %1371 = vrot.lane.b32.xlu1 %v3651_v17, %s3499_s11  ;;  %v416_v37 = vsel %vm267_vm2, %v411_v36, 0 }
 0x2ff   :  { %1419 = vrot.lane.b32.xlu0 %v3673_v18, %s3499_s11  ;;  %2927 = vmatmul.mubr.msk.bf16.vlgmr.msra.gmra.mrb[8].mxu0 %vm267_vm2, %v3641_v13 }
 0x300   :  { %1563 = vrot.lane.b32.xlu1 %v3689_v23, %s3499_s11  ;;  %2937 = vmatpush3.bf16.xpose.msra.mxu0 %v416_v37 }
 0x301   :  { %2938 = vmatprep.mubr.msk.bf16.mxu0 %vm3507_vm1, %v3506_v16  ;;  %2948 = vmatprep.subr.bf16.mxu0 %v3506_v16 }
 0x303   :  { %1515 = vrot.lane.b32.xlu0 %v3683_v21, %s3499_s11 }
 0x304   :  { %1467 = vrot.lane.b32.xlu1 %v3677_v19, %s3499_s11 }
 0x307   :  { %2939 = vmatmul.mubr.msk.bf16.vlgmr.msra.gmra.mrb[12].mxu0 %vm267_vm2, %v3651_v17 }
 0x308   :  { %2950 = vmatprep.mubr.msk.bf16.mxu0 %vm3507_vm1, %v3506_v16 }
 0x34b   :  { %v459_v38 = vpop.permute.xlu0 %458 }
 0x34c   :  { %v464_v39 = vsel %vm267_vm2, %v459_v38, 0 }
 0x34d   :  { %v507_v40 = vpop.permute.xlu1 %506  ;;  %2943 = vmatpush3.bf16.xpose.msra.mxu1 %v464_v39 }
 0x34e   :  { %v512_v42 = vsel %vm267_vm2, %v507_v40, 0  ;;  %2954 = vmatprep.subr.bf16.mxu1 %v3506_v16 }
 0x34f   :  { %2949 = vmatpush3.bf16.xpose.msra.mxu0 %v512_v42 }
 0x350   :  { %2960 = vmatprep.subr.bf16.mxu0 %v3506_v16 }
 0x351   :  { %v555_v43 = vpop.permute.xlu0 %554 }
 0x352   :  { %v560_v44 = vsel %vm267_vm2, %v555_v43, 0 }
 0x354   :  { %2945 = vmatmul.mubr.msk.bf16.vlgmr.msra.gmra.mrb[4].mxu1 %vm267_vm2, %v3673_v18 }
 0x355   :  { %v603_v45 = vpop.permute.xlu1 %602  ;;  %2955 = vmatpush3.bf16.xpose.msra.mxu1 %v560_v44  ;;  %2956 = vmatprep.mubr.msk.bf16.mxu1 %vm3507_vm1, %v3506_v16  ;;  %v651_v47 = vpop.permute.xlu0 %650 }
 0x356   :  { %v608_v46 = vsel %vm267_vm2, %v603_v45, 0  ;;  %2951 = vmatmul.mubr.msk.bf16.vlgmr.msra.gmra.mrb[16].mxu0 %vm267_vm2, %v3677_v19  ;;  %2966 = vmatprep.subr.bf16.mxu1 %v3506_v16  ;;  %v656_v49 = vsel %vm267_vm2, %v651_v47, 0 }
 0x357   :  { %2961 = vmatpush3.bf16.xpose.msra.mxu0 %v608_v46  ;;  %2962 = vmatprep.mubr.msk.bf16.mxu0 %vm3507_vm1, %v3506_v16 }
 0x358   :  { %2972 = vmatprep.subr.bf16.mxu0 %v3506_v16 }
 0x359   :  { %v699_v48 = vpop.permute.xlu1 %698  ;;  %v747_v51 = vpop.permute.xlu0 %746 }
 0x35a   :  { %v704_v50 = vsel %vm267_vm2, %v699_v48, 0  ;;  %v752_v53 = vsel %vm267_vm2, %v747_v51, 0 }
 0x35c   :  { %2957 = vmatmul.mubr.msk.bf16.vlgmr.msra.gmra.mrb[8].mxu1 %vm267_vm2, %v3683_v21 }
 0x35d   :  { %2967 = vmatpush3.bf16.xpose.msra.mxu1 %v656_v49  ;;  %2968 = vmatprep.mubr.msk.bf16.mxu1 %vm3507_vm1, %v3506_v16  ;;  %v795_v52 = vpop.permute.xlu1 %794  ;;  %v843_v55 = vpop.permute.xlu0 %842 }
 0x35e   :  { %2963 = vmatmul.mubr.msk.bf16.vlgmr.msra.gmra.mrb[20].mxu0 %vm267_vm2, %v3689_v23  ;;  %2978 = vmatprep.subr.bf16.mxu1 %v3506_v16  ;;  %v800_v54 = vsel %vm267_vm2, %v795_v52, 0  ;;  %v848_v57 = vsel %vm267_vm2, %v843_v55, 0 }
 0x35f   :  { %2973 = vmatpush3.bf16.xpose.msra.mxu0 %v704_v50  ;;  %2974 = vmatprep.mubr.msk.bf16.mxu0 %vm3507_vm1, %v3506_v16 }
 0x360   :  { %2984 = vmatprep.subr.bf16.mxu0 %v3506_v16 }
 0x361   :  { %v891_v56 = vpop.permute.xlu1 %890 }
 0x362   :  { %v896_v58 = vsel %vm267_vm2, %v891_v56, 0 }
 0x364   :  { %2969 = vmatmul.mubr.msk.bf16.vlgmr.msra.gmra.mrb[12].mxu1 %vm267_vm2, %v3681_v20 }
 0x365   :  { %2979 = vmatpush3.bf16.xpose.msra.mxu1 %v752_v53  ;;  %2980 = vmatprep.mubr.msk.bf16.mxu1 %vm3507_vm1, %v3506_v16  ;;  %v939_v59 = vpop.permute.xlu0 %938  ;;  %v987_v60 = vpop.permute.xlu1 %986 }
 0x366   :  { %2975 = vmatmul.mubr.msk.bf16.vlgmr.msra.gmra.mrb[24].mxu0 %vm267_vm2, %v3697_v25  ;;  %2990 = vmatprep.subr.bf16.mxu1 %v3506_v16  ;;  %v944_v61 = vsel %vm267_vm2, %v939_v59, 0  ;;  %v992_v62 = vsel %vm267_vm2, %v987_v60, 0 }
 0x367   :  { %2985 = vmatpush3.bf16.xpose.msra.mxu0 %v800_v54  ;;  %2986 = vmatprep.mubr.msk.bf16.mxu0 %vm3507_vm1, %v3506_v16 }
 0x368   :  { %2996 = vmatprep.subr.bf16.mxu0 %v3506_v16 }
 0x369   :  { %v1227_v63 = vpop.permute.xlu0 %1226  ;;  %v1276_v0 = vpop.permute.xlu1 %1275 }
 0x36a   :  { %v1233_v1 = vsel %vm1231_vm3, %v1227_v63, 0  ;;  %v1281_v2 = vsel %vm1231_vm3, %v1276_v0, 0 }
 0x36c   :  { %2981 = vmatmul.mubr.msk.bf16.vlgmr.msra.gmra.mrb[16].mxu1 %vm267_vm2, %v3687_v22 }
 0x36d   :  { %2991 = vmatpush3.bf16.xpose.msra.mxu1 %v848_v57  ;;  %2992 = vmatprep.mubr.msk.bf16.mxu1 %vm3507_vm1, %v3506_v16 }
 0x36e   :  { %2987 = vmatmul.mubr.msk.bf16.vlgmr.msra.gmra.mrb[28].mxu0 %vm267_vm2, %v3704_v28  ;;  %3002 = vmatprep.subr.bf16.mxu1 %v3506_v16 }
 0x36f   :  { %2997 = vmatpush3.bf16.xpose.msra.mxu0 %v896_v58  ;;  %2998 = vmatprep.mubr.msk.bf16.mxu0 %vm3507_vm1, %v3506_v16 }
 0x370   :  { %3008 = vmatprep.subr.bf16.mxu0 %v3506_v16 }
 0x374   :  { %2993 = vmatmul.mubr.msk.bf16.vlgmr.msra.gmra.mrb[20].mxu1 %vm267_vm2, %v3695_v24 }
 0x375   :  { %3003 = vmatpush3.bf16.xpose.msra.mxu1 %v944_v61  ;;  %3004 = vmatprep.mubr.msk.bf16.mxu1 %vm3507_vm1, %v3506_v16 }
 0x376   :  { %2999 = vmatmul.mubr.msk.bf16.vlgmr.msra.gmra.mrb[32].mxu0 %vm267_vm2, %v3713_v30  ;;  %3014 = vmatprep.subr.bf16.mxu1 %v3506_v16 }
 0x377   :  { %3009 = vmatpush3.bf16.xpose.msra.mxu0 %v992_v62  ;;  %3010 = vmatprep.mubr.msk.bf16.mxu0 %vm3507_vm1, %v3506_v16 }
 0x378   :  { %3020 = vmatprep.subr.bf16.mxu0 %v3506_v16 }
 0x37c   :  { %3005 = vmatmul.mubr.msk.bf16.vlgmr.msra.gmra.mrb[24].mxu1 %vm267_vm2, %v3720_v33 }
 0x37d   :  { %3015 = vmatpush3.bf16.msra.mxu1 %v1233_v1  ;;  %3016 = vmatprep.mubr.msk.bf16.mxu1 %vm3507_vm1, %v3506_v16 }
 0x37e   :  { %3011 = vmatmul.mubr.msk.bf16.vlgmr.msra.gmra.mrb[36].mxu0 %vm267_vm2, %v3710_v29  ;;  %3026 = vmatprep.subr.bf16.mxu1 %v3506_v16 }
 0x37f   :  { %3021 = vmatpush3.bf16.msra.mxu0 %v1281_v2  ;;  %3022 = vmatprep.mubr.msk.bf16.mxu0 %vm3507_vm1, %v3506_v16 }
 0x380   :  { %3032 = vmatprep.subr.bf16.mxu0 %v3506_v16 }
 0x3c4   :  { %v3837_v3 = vpop.f32.mrb[4].mxu0 }
 0x3c5   :  { %v2922_v4 = vpop.f32.mrb[5].mxu0  ;;  %v1034_v12 = vsel %vm267_vm2, %v3837_v3, -inf }
 0x3c6   :  { %v311_v5 = vpop.f32.mrb[6].mxu0 }
 0x3c7   :  { %v2923_v6 = vpop.f32.mrb[7].mxu0 }
 0x3cc   :  { %v3839_v7 = vpop.f32.mrb[0].mxu1 }
 0x3cd   :  { %v2934_v8 = vpop.f32.mrb[1].mxu1  ;;  %v1040_v9 = vsel %vm267_vm2, %v3839_v7, -inf }
 0x3ce   :  { %1041 = vmax.xlane.f32.xlu0 %v1040_v9  ;;  %v407_v10 = vpop.f32.mrb[2].mxu1 }
 0x3cf   :  { %v2935_v11 = vpop.f32.mrb[3].mxu1 }
 0x3d2   :  { %v3845_v13 = vpop.f32.mrb[8].mxu0  ;;  %1035 = vmax.xlane.f32.xlu0 %v1034_v12 }
 0x3d3   :  { %v2928_v14 = vpop.f32.mrb[9].mxu0  ;;  %v1037_v15 = vsel %vm267_vm2, %v3845_v13, -inf }
 0x3d4   :  { %v359_v17 = vpop.f32.mrb[10].mxu0  ;;  %1038 = vmax.xlane.f32.xlu1 %v1037_v15 }
 0x3d5   :  { %v2929_v18 = vpop.f32.mrb[11].mxu0 }
 0x3da   :  { %v3849_v19 = vpop.f32.mrb[12].mxu0 }
 0x3db   :  { %v2940_v21 = vpop.f32.mrb[13].mxu0  ;;  %v1043_v23 = vsel %vm267_vm2, %v3849_v19, -inf }
 0x3dc   :  { %v455_v26 = vpop.f32.mrb[14].mxu0  ;;  %1044 = vmax.xlane.f32.xlu0 %v1043_v23 }
 0x3dd   :  { %v2941_v27 = vpop.f32.mrb[15].mxu0 }
 0x427   :  { %v3853_v31 = vpop.f32.mrb[4].mxu1 }
 0x428   :  { %v2946_v32 = vpop.f32.mrb[5].mxu1  ;;  %v1046_v34 = vsel %vm267_vm2, %v3853_v31, -inf }
 0x429   :  { %v3857_v35 = vpop.f32.mrb[16].mxu0  ;;  %1047 = vmax.xlane.f32.xlu0 %v1046_v34  ;;  %v503_v36 = vpop.f32.mrb[6].mxu1 }
 0x42a   :  { %v2947_v37 = vpop.f32.mrb[7].mxu1  ;;  %v2952_v38 = vpop.f32.mrb[17].mxu0  ;;  %v1049_v39 = vsel %vm267_vm2, %v3857_v35, -inf }
 0x42b   :  { %v551_v40 = vpop.f32.mrb[18].mxu0  ;;  %1050 = vmax.xlane.f32.xlu1 %v1049_v39 }
 0x42c   :  { %v2953_v42 = vpop.f32.mrb[19].mxu0 }
 0x42f   :  { %v3861_v43 = vpop.f32.mrb[8].mxu1 }
 0x430   :  { %v2958_v44 = vpop.f32.mrb[9].mxu1  ;;  %v1052_v45 = vsel %vm267_vm2, %v3861_v43, -inf }
 0x431   :  { %v3865_v46 = vpop.f32.mrb[20].mxu0  ;;  %1053 = vmax.xlane.f32.xlu0 %v1052_v45  ;;  %v599_v47 = vpop.f32.mrb[10].mxu1 }
 0x432   :  { %v2959_v48 = vpop.f32.mrb[11].mxu1  ;;  %v2964_v49 = vpop.f32.mrb[21].mxu0  ;;  %v1055_v50 = vsel %vm267_vm2, %v3865_v46, -inf }
 0x433   :  { %v647_v51 = vpop.f32.mrb[22].mxu0  ;;  %1056 = vmax.xlane.f32.xlu1 %v1055_v50  ;;  %v3899_v45 = vpop.permute.xlu0 %1323 }
 0x434   :  { %v2965_v52 = vpop.f32.mrb[23].mxu0  ;;  %v3907_v48 = vpop.permute.xlu1 %1371 }
 0x437   :  { %v3869_v53 = vpop.f32.mrb[12].mxu1  ;;  %v3905_v47 = vpop.permute.xlu0 %1419 }
 0x438   :  { %v2970_v54 = vpop.f32.mrb[13].mxu1  ;;  %v1058_v55 = vsel %vm267_vm2, %v3869_v53, -inf  ;;  %v3915_v50 = vpop.permute.xlu1 %1563 }
 0x439   :  { %v3873_v56 = vpop.f32.mrb[24].mxu0  ;;  %1059 = vmax.xlane.f32.xlu0 %v1058_v55  ;;  %v695_v57 = vpop.f32.mrb[14].mxu1 }
 0x43a   :  { %v2971_v58 = vpop.f32.mrb[15].mxu1  ;;  %v2976_v59 = vpop.f32.mrb[25].mxu0  ;;  %v1061_v60 = vsel %vm267_vm2, %v3873_v56, -inf }
 0x43b   :  { %v743_v61 = vpop.f32.mrb[26].mxu0  ;;  %1062 = vmax.xlane.f32.xlu1 %v1061_v60  ;;  %v3911_v49 = vpop.permute.xlu0 %1515 }
 0x43c   :  { %v2977_v62 = vpop.f32.mrb[27].mxu0  ;;  %v3917_v52 = vpop.permute.xlu1 %1467 }
 0x43f   :  { %v3877_v63 = vpop.f32.mrb[16].mxu1 }
 0x440   :  { %v2982_v0 = vpop.f32.mrb[17].mxu1  ;;  %v1064_v1 = vsel %vm267_vm2, %v3877_v63, -inf }
 0x441   :  { %v3881_v2 = vpop.f32.mrb[28].mxu0  ;;  %1065 = vmax.xlane.f32.xlu0 %v1064_v1  ;;  %v791_v4 = vpop.f32.mrb[18].mxu1 }
 0x442   :  { %v2983_v5 = vpop.f32.mrb[19].mxu1  ;;  %v2988_v6 = vpop.f32.mrb[29].mxu0  ;;  %v1067_v8 = vsel %vm267_vm2, %v3881_v2, -inf }
 0x443   :  { %v839_v9 = vpop.f32.mrb[30].mxu0  ;;  %1068 = vmax.xlane.f32.xlu1 %v1067_v8 }
 0x444   :  { %v2989_v10 = vpop.f32.mrb[31].mxu0 }
 0x447   :  { %v3885_v11 = vpop.f32.mrb[20].mxu1 }
 0x448   :  { %v2994_v12 = vpop.f32.mrb[21].mxu1  ;;  %v1070_v14 = vsel %vm267_vm2, %v3885_v11, -inf }
 0x449   :  { %v3889_v15 = vpop.f32.mrb[32].mxu0  ;;  %1071 = vmax.xlane.f32.xlu0 %v1070_v14  ;;  %v887_v17 = vpop.f32.mrb[22].mxu1 }
 0x44a   :  { %v2995_v18 = vpop.f32.mrb[23].mxu1  ;;  %v3000_v21 = vpop.f32.mrb[33].mxu0  ;;  %v1073_v23 = vsel %vm267_vm2, %v3889_v15, -inf }
 0x44b   :  { %v935_v26 = vpop.f32.mrb[34].mxu0  ;;  %1074 = vmax.xlane.f32.xlu1 %v1073_v23 }
 0x44c   :  { %v3001_v27 = vpop.f32.mrb[35].mxu0 }
 0x44f   :  { %v3893_v32 = vpop.f32.mrb[24].mxu1 }
 0x450   :  { %v3006_v34 = vpop.f32.mrb[25].mxu1  ;;  %v1076_v36 = vsel %vm267_vm2, %v3893_v32, -inf }
 0x451   :  { %v3897_v37 = vpop.f32.mrb[36].mxu0  ;;  %1077 = vmax.xlane.f32.xlu0 %v1076_v36  ;;  %v983_v38 = vpop.f32.mrb[26].mxu1 }
 0x452   :  { %v3007_v39 = vpop.f32.mrb[27].mxu1  ;;  %v3012_v40 = vpop.f32.mrb[37].mxu0 }
 0x453   :  { %v1031_v42 = vpop.f32.mrb[38].mxu0 }
 0x454   :  { %v3013_v44 = vpop.f32.mrb[39].mxu0 }
 0x45b   :  { %v1042_v51 = vpop.xlane.xlu0 %1041 }
 0x45c   :  { %1659 = vrot.lane.b32.xlu1 %v3697_v25, %s3499_s11  ;;  %v1084_v25 = vsub.f32 %v3839_v7, %v1042_v51 }
 0x45e   :  { %v1102_v55 = vmul.f32 1.442695, %v1084_v25 }
 0x460   :  { %1707 = vrot.lane.b32.xlu1 %v3687_v22, %s3499_s11  ;;  %v1036_v22 = vpop.xlane.xlu0 %1035  ;;  %3303 = vpow2.f32 %v1102_v55 }
 0x461   :  { %v1039_v54 = vpop.xlane.xlu1 %1038  ;;  %v1082_v57 = vsub.f32 %v3837_v3, %v1036_v22  ;;  %v1079_v3 = vsel %vm267_vm2, %v3897_v37, -inf }
 0x462   :  { %v1083_v58 = vsub.f32 %v3845_v13, %v1039_v54 }
 0x463   :  { %v1098_v59 = vmul.f32 1.442695, %v1082_v57 }
 0x464   :  { %1755 = vrot.lane.b32.xlu1 %v3704_v28, %s3499_s11  ;;  %v1100_v60 = vmul.f32 1.442695, %v1083_v58 }
 0x465   :  { %3305 = vpow2.f32 %v1098_v59 }
 0x466   :  { %3307 = vpow2.f32 %v1100_v60 }
 0x467   :  { %1611 = vrot.lane.b32.xlu0 %v3681_v20, %s3499_s11 }
 0x469   :  { %v1045_v28 = vpop.xlane.xlu0 %1044 }
 0x46a   :  { %v1085_v20 = vsub.f32 %v3849_v19, %v1045_v28  ;;  %v3923_v62 = vpop.eup %3303 }
 0x46b   :  { %v1136_v7 = vsel %vm267_vm2, %v3923_v62, 0.0 }
 0x46c   :  { %v1104_v61 = vmul.f32 1.442695, %v1085_v20 }
 0x46e   :  { %3309 = vpow2.f32 %v1104_v61 }
 0x46f   :  { %v3927_v0 = vpop.eup %3305 }
 0x470   :  { %v3931_v13 = vpop.eup %3307  ;;  %v1130_v19 = vsel %vm267_vm2, %v3927_v0, 0.0 }
 0x471   :  { %v1133_v1 = vsel %vm267_vm2, %v3931_v13, 0.0 }
 0x478   :  { %v3937_v4 = vpop.eup %3309 }
 0x479   :  { %v1139_v5 = vsel %vm267_vm2, %v3937_v4, 0.0 }
 0x486   :  { %1137 = vadd.xlane.f32.xlu0 %v1136_v7 }
 0x488   :  { %1080 = vmax.xlane.f32.xlu1 %v1079_v3 }
 0x48a   :  { %1131 = vadd.xlane.f32.xlu0 %v1130_v19 }
 0x48c   :  { %1134 = vadd.xlane.f32.xlu1 %v1133_v1 }
 0x490   :  { %1140 = vadd.xlane.f32.xlu1 %v1139_v5 }
 0x4b6   :  { %v1048_v6 = vpop.xlane.xlu0 %1047 }
 0x4b7   :  { %v1086_v8 = vsub.f32 %v3853_v31, %v1048_v6 }
 0x4b8   :  { %v1051_v9 = vpop.xlane.xlu1 %1050 }
 0x4b9   :  { %v1106_v10 = vmul.f32 1.442695, %v1086_v8  ;;  %v1087_v12 = vsub.f32 %v3857_v35, %v1051_v9 }
 0x4bb   :  { %3311 = vpow2.f32 %v1106_v10  ;;  %v1108_v14 = vmul.f32 1.442695, %v1087_v12 }
 0x4bd   :  { %3313 = vpow2.f32 %v1108_v14 }
 0x4be   :  { %v1054_v17 = vpop.xlane.xlu0 %1053 }
 0x4bf   :  { %v1088_v18 = vsub.f32 %v3861_v43, %v1054_v17 }
 0x4c0   :  { %v1057_v21 = vpop.xlane.xlu1 %1056 }
 0x4c1   :  { %v1110_v23 = vmul.f32 1.442695, %v1088_v18  ;;  %v1089_v26 = vsub.f32 %v3865_v46, %v1057_v21 }
 0x4c3   :  { %3315 = vpow2.f32 %v1110_v23  ;;  %v1112_v27 = vmul.f32 1.442695, %v1089_v26 }
 0x4c5   :  { %v3945_v34 = vpop.eup %3311  ;;  %3317 = vpow2.f32 %v1112_v27 }
 0x4c6   :  { %v1060_v31 = vpop.xlane.xlu0 %1059  ;;  %v1142_v36 = vsel %vm267_vm2, %v3945_v34, 0.0 }
 0x4c7   :  { %v3949_v35 = vpop.eup %3313  ;;  %v1090_v38 = vsub.f32 %v3869_v53, %v1060_v31  ;;  %1143 = vadd.xlane.f32.xlu0 %v1142_v36 }
 0x4c8   :  { %v1063_v39 = vpop.xlane.xlu1 %1062  ;;  %v1145_v43 = vsel %vm267_vm2, %v3949_v35, 0.0 }
 0x4c9   :  { %v1114_v40 = vmul.f32 1.442695, %v1090_v38  ;;  %v1091_v46 = vsub.f32 %v3873_v56, %v1063_v39  ;;  %1146 = vadd.xlane.f32.xlu1 %v1145_v43 }
 0x4cb   :  { %3319 = vpow2.f32 %v1114_v40  ;;  %v1116_v42 = vmul.f32 1.442695, %v1091_v46 }
 0x4cd   :  { %v3955_v44 = vpop.eup %3315  ;;  %3321 = vpow2.f32 %v1116_v42 }
 0x4ce   :  { %v1066_v51 = vpop.xlane.xlu0 %1065  ;;  %v1148_v25 = vsel %vm267_vm2, %v3955_v44, 0.0 }
 0x4cf   :  { %v3959_v22 = vpop.eup %3317  ;;  %v1092_v53 = vsub.f32 %v3877_v63, %v1066_v51  ;;  %1149 = vadd.xlane.f32.xlu0 %v1148_v25 }
 0x4d0   :  { %v1069_v54 = vpop.xlane.xlu1 %1068  ;;  %v1151_v55 = vsel %vm267_vm2, %v3959_v22, 0.0 }
 0x4d1   :  { %v1118_v56 = vmul.f32 1.442695, %v1092_v53  ;;  %v1093_v57 = vsub.f32 %v3881_v2, %v1069_v54  ;;  %1152 = vadd.xlane.f32.xlu1 %v1151_v55  ;;  %v1329_v55 = vsel %vm1231_vm3, %v3899_v45, 0 }
 0x4d3   :  { %3323 = vpow2.f32 %v1118_v56  ;;  %v1120_v58 = vmul.f32 1.442695, %v1093_v57 }
 0x4d5   :  { %v3965_v28 = vpop.eup %3319  ;;  %3325 = vpow2.f32 %v1120_v58 }
 0x4d6   :  { %v1154_v59 = vsel %vm267_vm2, %v3965_v28, 0.0  ;;  %v1072_v3 = vpop.xlane.xlu0 %1071 }
 0x4d7   :  { %v3969_v60 = vpop.eup %3321  ;;  %1155 = vadd.xlane.f32.xlu1 %v1154_v59  ;;  %v1094_v1 = vsub.f32 %v3885_v11, %v1072_v3 }
 0x4d8   :  { %v1157_v63 = vsel %vm267_vm2, %v3969_v60, 0.0  ;;  %v1075_v19 = vpop.xlane.xlu1 %1074 }
 0x4d9   :  { %1158 = vadd.xlane.f32.xlu0 %v1157_v63  ;;  %v1095_v6 = vsub.f32 %v3889_v15, %v1075_v19  ;;  %v1122_v8 = vmul.f32 1.442695, %v1094_v1  ;;  %v1521_v1 = vsel %vm1231_vm3, %v3911_v49, 0 }
 0x4db   :  { %v1124_v10 = vmul.f32 1.442695, %v1095_v6  ;;  %3327 = vpow2.f32 %v1122_v8  ;;  %v1569_v6 = vsel %vm1231_vm3, %v3915_v50, 0 }
 0x4dc   :  { %v3988_v12 = vpop.permute.xlu1 %1659 }
 0x4dd   :  { %v3973_v20 = vpop.eup %3323  ;;  %3329 = vpow2.f32 %v1124_v10 }
 0x4de   :  { %v1160_v2 = vsel %vm267_vm2, %v3973_v20, 0.0  ;;  %v1078_v5 = vpop.xlane.xlu0 %1077 }
 0x4df   :  { %v3977_v61 = vpop.eup %3325  ;;  %1161 = vadd.xlane.f32.xlu1 %v1160_v2  ;;  %v1096_v9 = vsub.f32 %v3893_v32, %v1078_v5 }
 0x4e0   :  { %v1163_v7 = vsel %vm267_vm2, %v3977_v61, 0.0 }
 0x4e1   :  { %1164 = vadd.xlane.f32.xlu0 %v1163_v7  ;;  %v1126_v14 = vmul.f32 1.442695, %v1096_v9 }
 0x4e3   :  { %3331 = vpow2.f32 %v1126_v14 }
 0x4e5   :  { %v3994_v17 = vpop.eup %3327 }
 0x4e6   :  { %v1166_v32 = vsel %vm267_vm2, %v3994_v17, 0.0 }
 0x4e7   :  { %v3998_v18 = vpop.eup %3329 }
 0x4e8   :  { %v1169_v26 = vsel %vm267_vm2, %v3998_v18, 0.0 }
 0x4ed   :  { %v4002_v21 = vpop.eup %3331 }
 0x4ee   :  { %v1172_v36 = vsel %vm267_vm2, %v4002_v21, 0.0 }
 0x4f0   :  { %1851 = vrot.lane.b32.xlu1 %v3713_v30, %s3499_s11  ;;  %v3990_v30 = vpop.permute.xlu1 %1707 }
 0x4f4   :  { %v3996_v11 = vpop.permute.xlu1 %1755 }
 0x4f7   :  { %1803 = vrot.lane.b32.xlu0 %v3695_v24, %s3499_s11  ;;  %v3992_v24 = vpop.permute.xlu0 %1611 }
 0x4f8   :  { %v1617_v50 = vsel %vm1231_vm3, %v3992_v24, 0 }
 0x513   :  { %v1138_v15 = vpop.xlane.xlu0 %1137 }
 0x514   :  { %1167 = vadd.xlane.f32.xlu1 %v1166_v32 }
 0x515   :  { %v1081_v23 = vpop.xlane.xlu1 %1080 }
 0x516   :  { %v1097_v27 = vsub.f32 %v3897_v37, %v1081_v23  ;;  %1170 = vadd.xlane.f32.xlu0 %v1169_v26 }
 0x517   :  { %v1132_v31 = vpop.xlane.xlu0 %1131 }
 0x518   :  { %v1128_v38 = vmul.f32 1.442695, %v1097_v27  ;;  %3333 = vrcp.f32 %v1132_v31  ;;  %1173 = vadd.xlane.f32.xlu1 %v1172_v36  ;;  %v1761_v36 = vsel %vm1231_vm3, %v3996_v11, 0 }
 0x519   :  { %v1135_v39 = vpop.xlane.xlu1 %1134 }
 0x51a   :  { %3335 = vpow2.f32 %v1128_v38 }
 0x51b   :  { %3337 = vrcp.f32 %v1135_v39 }
 0x51c   :  { %3339 = vrcp.f32 %v1138_v15 }
 0x51d   :  { %v1141_v43 = vpop.xlane.xlu1 %1140 }
 0x51e   :  { %3341 = vrcp.f32 %v1141_v43 }
 0x522   :  { %v3334_v40 = vpop.eup %3333 }
 0x523   :  { %v1194_v46 = vmul.f32 %v3334_v40, %v3927_v0 }
 0x524   :  { %v4010_v42 = vpop.eup %3335 }
 0x525   :  { %v3338_v37 = vpop.eup %3337  ;;  %v1175_v51 = vsel %vm267_vm2, %v4010_v42, 0.0  ;;  %v1210_v25 = vpack.c.bf16 %v1194_v46, %v1194_v46 }
 0x526   :  { %v3340_v53 = vpop.eup %3339  ;;  %v1195_v54 = vmul.f32 %v3338_v37, %v3931_v13  ;;  %1176 = vadd.xlane.f32.xlu0 %v1175_v51  ;;  %v1377_v13 = vsel %vm1231_vm3, %v3907_v48, 0  ;;  %v1473_v48 = vsel %vm1231_vm3, %v3917_v52, 0 }
 0x527   :  { %3017 = vmatmul.mubr.msk.bf16.vlgmr.msra.gmra.mrb[28].mxu1 %vm267_vm2, %v1210_v25  ;;  %v1196_v57 = vmul.f32 %v3340_v53, %v3923_v62  ;;  %v1425_v62 = vsel %vm1231_vm3, %v3905_v47, 0 }
 0x528   :  { %3027 = vmatpush3.bf16.msra.mxu1 %v1329_v55  ;;  %v1211_v56 = vpack.c.bf16 %v1195_v54, %v1195_v54  ;;  %3028 = vmatprep.mubr.msk.bf16.mxu1 %vm3507_vm1, %v3506_v16  ;;  %v3342_v0 = vpop.eup %3341 }
 0x529   :  { %1947 = vrot.lane.b32.xlu1 %v3710_v29, %s3499_s11  ;;  %3038 = vmatprep.subr.bf16.mxu1 %v3506_v16  ;;  %v1197_v45 = vmul.f32 %v3342_v0, %v3937_v4  ;;  %v1212_v58 = vpack.c.bf16 %v1196_v57, %v1196_v57 }
 0x52a   :  { %3023 = vmatmul.mubr.msk.bf16.vlgmr.msra.gmra.mrb[40].mxu0 %vm267_vm2, %v1211_v56 }
 0x52b   :  { %3033 = vmatpush3.bf16.msra.mxu0 %v1377_v13  ;;  %3034 = vmatprep.mubr.msk.bf16.mxu0 %vm3507_vm1, %v3506_v16  ;;  %v1213_v29 = vpack.c.bf16 %v1197_v45, %v1197_v45 }
 0x52c   :  { %3044 = vmatprep.subr.bf16.mxu0 %v3506_v16 }
 0x52f   :  { %3029 = vmatmul.mubr.msk.bf16.vlgmr.msra.gmra.mrb[32].mxu1 %vm267_vm2, %v1212_v58 }
 0x530   :  { %3039 = vmatpush3.bf16.msra.mxu1 %v1425_v62  ;;  %3040 = vmatprep.mubr.msk.bf16.mxu1 %vm3507_vm1, %v3506_v16 }
 0x531   :  { %3050 = vmatprep.subr.bf16.mxu1 %v3506_v16 }
 0x532   :  { %3035 = vmatmul.mubr.msk.bf16.vlgmr.msra.gmra.mrb[44].mxu0 %vm267_vm2, %v1213_v29 }
 0x533   :  { %3045 = vmatpush3.bf16.msra.mxu0 %v1473_v48  ;;  %3046 = vmatprep.mubr.msk.bf16.mxu0 %vm3507_vm1, %v3506_v16 }
 0x534   :  { %3056 = vmatprep.subr.bf16.mxu0 %v3506_v16 }
 0x53c   :  { %1899 = vrot.lane.b32.xlu0 %v3720_v33, %s3499_s11 }
 0x554   :  { %v1144_v47 = vpop.xlane.xlu0 %1143 }
 0x555   :  { %3343 = vrcp.f32 %v1144_v47 }
 0x556   :  { %v1147_v4 = vpop.xlane.xlu1 %1146 }
 0x557   :  { %3345 = vrcp.f32 %v1147_v4 }
 0x55c   :  { %v1150_v59 = vpop.xlane.xlu0 %1149 }
 0x55d   :  { %3347 = vrcp.f32 %v1150_v59 }
 0x55e   :  { %v1153_v63 = vpop.xlane.xlu1 %1152 }
 0x55f   :  { %v3344_v2 = vpop.eup %3343  ;;  %3349 = vrcp.f32 %v1153_v63 }
 0x560   :  { %v1198_v52 = vmul.f32 %v3344_v2, %v3945_v34 }
 0x561   :  { %v3346_v7 = vpop.eup %3345 }
 0x562   :  { %v1199_v3 = vmul.f32 %v3346_v7, %v3949_v35  ;;  %v1214_v19 = vpack.c.bf16 %v1198_v52, %v1198_v52 }
 0x564   :  { %v1156_v5 = vpop.xlane.xlu1 %1155  ;;  %3041 = vmatmul.mubr.msk.bf16.vlgmr.msra.gmra.mrb[36].mxu1 %vm267_vm2, %v1214_v19  ;;  %v1215_v33 = vpack.c.bf16 %v1199_v3, %v1199_v3 }
 0x565   :  { %3351 = vrcp.f32 %v1156_v5  ;;  %3051 = vmatpush3.bf16.msra.mxu1 %v1521_v1  ;;  %3052 = vmatprep.mubr.msk.bf16.mxu1 %vm3507_vm1, %v3506_v16 }
 0x566   :  { %3047 = vmatmul.mubr.msk.bf16.vlgmr.msra.gmra.mrb[48].mxu0 %vm267_vm2, %v1215_v33  ;;  %v1159_v34 = vpop.xlane.xlu0 %1158  ;;  %3062 = vmatprep.subr.bf16.mxu1 %v3506_v16 }
 0x567   :  { %v3348_v35 = vpop.eup %3347  ;;  %3057 = vmatpush3.bf16.msra.mxu0 %v1569_v6  ;;  %3353 = vrcp.f32 %v1159_v34  ;;  %3058 = vmatprep.mubr.msk.bf16.mxu0 %vm3507_vm1, %v3506_v16 }
 0x568   :  { %v1200_v49 = vmul.f32 %v3348_v35, %v3955_v44  ;;  %3068 = vmatprep.subr.bf16.mxu0 %v3506_v16  ;;  %v1665_v44 = vsel %vm1231_vm3, %v3988_v12, 0  ;;  %v1713_v12 = vsel %vm1231_vm3, %v3990_v30, 0 }
 0x569   :  { %v3350_v8 = vpop.eup %3349 }
 0x56a   :  { %v1201_v9 = vmul.f32 %v3350_v8, %v3959_v22  ;;  %v1216_v10 = vpack.c.bf16 %v1200_v49, %v1200_v49 }
 0x56c   :  { %v1162_v14 = vpop.xlane.xlu1 %1161  ;;  %3053 = vmatmul.mubr.msk.bf16.vlgmr.msra.gmra.mrb[40].mxu1 %vm267_vm2, %v1216_v10  ;;  %v1217_v15 = vpack.c.bf16 %v1201_v9, %v1201_v9  ;;  %v3275_v9 = vld [vmem:[%s4314_s6] sm:$0xff]   ;;  %v3276_v10 = vld [vmem:[%s4314_s6 + $0x10] sm:$0xff]  }
 0x56d   :  { %3355 = vrcp.f32 %v1162_v14  ;;  %3063 = vmatpush3.bf16.msra.mxu1 %v1617_v50  ;;  %3064 = vmatprep.mubr.msk.bf16.mxu1 %vm3507_vm1, %v3506_v16 }
 0x56e   :  { %3059 = vmatmul.mubr.msk.bf16.vlgmr.msra.gmra.mrb[52].mxu0 %vm267_vm2, %v1217_v15  ;;  %v1165_v32 = vpop.xlane.xlu0 %1164  ;;  %3074 = vmatprep.subr.bf16.mxu1 %v3506_v16 }
 0x56f   :  { %v3352_v22 = vpop.eup %3351  ;;  %3069 = vmatpush3.bf16.msra.mxu0 %v1665_v44  ;;  %3357 = vrcp.f32 %v1165_v32  ;;  %3070 = vmatprep.mubr.msk.bf16.mxu0 %vm3507_vm1, %v3506_v16 }
 0x570   :  { %v1202_v24 = vmul.f32 %v3352_v22, %v3965_v28  ;;  %3080 = vmatprep.subr.bf16.mxu0 %v3506_v16  ;;  %v1852_v40 = vpop.permute.xlu1 %1851 }
 0x571   :  { %v3354_v23 = vpop.eup %3353  ;;  %v1857_v37 = vsel %vm1231_vm3, %v1852_v40, 0 }
 0x572   :  { %v1203_v26 = vmul.f32 %v3354_v23, %v3969_v60  ;;  %v1218_v27 = vpack.c.bf16 %v1202_v24, %v1202_v24  ;;  %v1804_v38 = vpop.permute.xlu0 %1803 }
 0x573   :  { %v1809_v11 = vsel %vm1231_vm3, %v1804_v38, 0 }
 0x574   :  { %3065 = vmatmul.mubr.msk.bf16.vlgmr.msra.gmra.mrb[44].mxu1 %vm267_vm2, %v1218_v27  ;;  %v1219_v31 = vpack.c.bf16 %v1203_v26, %v1203_v26 }
 0x575   :  { %3075 = vmatpush3.bf16.msra.mxu1 %v1713_v12  ;;  %3076 = vmatprep.mubr.msk.bf16.mxu1 %vm3507_vm1, %v3506_v16 }
 0x576   :  { %3071 = vmatmul.mubr.msk.bf16.vlgmr.msra.gmra.mrb[56].mxu0 %vm267_vm2, %v1219_v31  ;;  %3086 = vmatprep.subr.bf16.mxu1 %v3506_v16 }
 0x577   :  { %v3356_v28 = vpop.eup %3355  ;;  %3081 = vmatpush3.bf16.msra.mxu0 %v1761_v36  ;;  %3082 = vmatprep.mubr.msk.bf16.mxu0 %vm3507_vm1, %v3506_v16 }
 0x578   :  { %v1204_v60 = vmul.f32 %v3356_v28, %v3973_v20  ;;  %3092 = vmatprep.subr.bf16.mxu0 %v3506_v16 }
 0x579   :  { %v3358_v30 = vpop.eup %3357 }
 0x57a   :  { %v1205_v39 = vmul.f32 %v3358_v30, %v3977_v61  ;;  %v1220_v43 = vpack.c.bf16 %v1204_v60, %v1204_v60 }
 0x57c   :  { %3077 = vmatmul.mubr.msk.bf16.vlgmr.msra.gmra.mrb[48].mxu1 %vm267_vm2, %v1220_v43  ;;  %v1221_v46 = vpack.c.bf16 %v1205_v39, %v1205_v39 }
 0x57d   :  { %3087 = vmatpush3.bf16.msra.mxu1 %v1809_v11  ;;  %3088 = vmatprep.mubr.msk.bf16.mxu1 %vm3507_vm1, %v3506_v16 }
 0x57e   :  { %3083 = vmatmul.mubr.msk.bf16.vlgmr.msra.gmra.mrb[60].mxu0 %vm267_vm2, %v1221_v46  ;;  %3098 = vmatprep.subr.bf16.mxu1 %v3506_v16 }
 0x57f   :  { %3093 = vmatpush3.bf16.msra.mxu0 %v1857_v37  ;;  %3094 = vmatprep.mubr.msk.bf16.mxu0 %vm3507_vm1, %v3506_v16 }
 0x580   :  { %3104 = vmatprep.subr.bf16.mxu0 %v3506_v16 }
 0x5a1   :  { %v1168_v20 = vpop.xlane.xlu1 %1167 }
 0x5a2   :  { %3359 = vrcp.f32 %v1168_v20 }
 0x5a3   :  { %v1171_v61 = vpop.xlane.xlu0 %1170 }
 0x5a4   :  { %3361 = vrcp.f32 %v1171_v61 }
 0x5a5   :  { %v1174_v51 = vpop.xlane.xlu1 %1173 }
 0x5a6   :  { %3363 = vrcp.f32 %v1174_v51 }
 0x5a9   :  { %v1948_v0 = vpop.permute.xlu1 %1947 }
 0x5aa   :  { %v1953_v45 = vsel %vm1231_vm3, %v1948_v0, 0 }
 0x5ac   :  { %v3360_v25 = vpop.eup %3359 }
 0x5ad   :  { %v1206_v53 = vmul.f32 %v3360_v25, %v3994_v17 }
 0x5ae   :  { %v3362_v54 = vpop.eup %3361 }
 0x5af   :  { %v1207_v55 = vmul.f32 %v3362_v54, %v3998_v18  ;;  %v1222_v56 = vpack.c.bf16 %v1206_v53, %v1206_v53 }
 0x5b0   :  { %v3364_v13 = vpop.eup %3363 }
 0x5b1   :  { %3089 = vmatmul.mubr.msk.bf16.vlgmr.msra.gmra.mrb[52].mxu1 %vm267_vm2, %v1222_v56  ;;  %v1223_v57 = vpack.c.bf16 %v1207_v55, %v1207_v55  ;;  %v1208_v17 = vmul.f32 %v3364_v13, %v4002_v21 }
 0x5b2   :  { %3100 = vmatprep.mubr.msk.bf16.mxu1 %vm3507_vm1, %v3506_v16 }
 0x5b3   :  { %3095 = vmatmul.mubr.msk.bf16.vlgmr.msra.gmra.mrb[64].mxu0 %vm267_vm2, %v1223_v57  ;;  %v1177_v58 = vpop.xlane.xlu0 %1176  ;;  %v1224_v29 = vpack.c.bf16 %v1208_v17, %v1208_v17 }
 0x5b4   :  { %3105 = vmatpush3.bf16.msra.mxu0 %v1953_v45  ;;  %3365 = vrcp.f32 %v1177_v58  ;;  %3106 = vmatprep.mubr.msk.bf16.mxu0 %vm3507_vm1, %v3506_v16 }
 0x5b7   :  { %v1900_v18 = vpop.permute.xlu0 %1899 }
 0x5b8   :  { %v1905_v62 = vsel %vm1231_vm3, %v1900_v18, 0 }
 0x5b9   :  { %3099 = vmatpush3.bf16.msra.mxu1 %v1905_v62 }
 0x5bc   :  { %3101 = vmatmul.mubr.msk.bf16.vlgmr.msra.gmra.mrb[56].mxu1 %vm267_vm2, %v1224_v29 }
 0x5bd   :  { %3126 = vmatprep.mubr.bf16.mxu1 %v3275_v9 }
 0x5be   :  { %v3366_v48 = vpop.eup %3365 }
 0x5bf   :  { %v1209_v47 = vmul.f32 %v3366_v48, %v4010_v42 }
 0x5c1   :  { %v1225_v4 = vpack.c.bf16 %v1209_v47, %v1209_v47 }
 0x5c3   :  { %3107 = vmatmul.mubr.msk.bf16.vlgmr.msra.gmra.mrb[68].mxu0 %vm267_vm2, %v1225_v4 }
 0x5c4   :  { %3146 = vmatprep.mubr.bf16.mxu0 %v3276_v10 }
 0x5fa   :  { %v1269_v59 = vpop.f32.mrb[28].mxu1 }
 0x5fb   :  { %v3018_v63 = vpop.f32.mrb[29].mxu1 }
 0x5fc   :  { %v1272_v2 = vpop.f32.mrb[30].mxu1 }
 0x5fd   :  { %v1317_v52 = vpop.f32.mrb[40].mxu0  ;;  %v3019_v16 = vpop.f32.mrb[31].mxu1 }
 0x5fe   :  { %v4113_v7 = vpack.c.bf16 %v1317_v52, %v1269_v59  ;;  %v3024_v21 = vpop.f32.mrb[41].mxu0 }
 0x5ff   :  { %v1320_v3 = vpop.f32.mrb[42].mxu0 }
 0x600   :  { %v3025_v19 = vpop.f32.mrb[43].mxu0  ;;  %3110 = vmatprep.subr.bf16.mxu1 %v4113_v7  ;;  %3130 = vmatprep.subr.bf16.mxu0 %v4113_v7 }
 0x601   :  { %3111 = vmatpush3.bf16.msra.mxu1 %v4113_v7  ;;  %3131 = vmatpush3.bf16.msra.mxu0 %v4113_v7 }
 0x602   :  { %v1365_v42 = vpop.f32.mrb[32].mxu1 }
 0x603   :  { %v3030_v1 = vpop.f32.mrb[33].mxu1 }
 0x604   :  { %v1368_v5 = vpop.f32.mrb[34].mxu1 }
 0x605   :  { %v1413_v33 = vpop.f32.mrb[44].mxu0  ;;  %v3031_v6 = vpop.f32.mrb[35].mxu1 }
 0x606   :  { %v4119_v34 = vpack.c.bf16 %v1413_v33, %v1365_v42  ;;  %v3036_v35 = vpop.f32.mrb[45].mxu0  ;;  %v3277_v33 = vld [vmem:[%s4314_s6 + $0x8] sm:$0xff]   ;;  %v3278_v6 = vld [vmem:[%s4314_s6 + $0x18] sm:$0xff]  }
 0x607   :  { %v1416_v49 = vpop.f32.mrb[46].mxu0  ;;  %v3279_v35 = vld [vmem:[%s4314_s6 + $0x20] sm:$0xff]  }
 0x608   :  { %v3037_v8 = vpop.f32.mrb[47].mxu0  ;;  %3112 = vmatprep.subr.bf16.mxu1 %v4119_v34  ;;  %3132 = vmatprep.subr.bf16.mxu0 %v4119_v34  ;;  %v3281_v49 = vld [vmem:[%s4314_s6 + $0x30] sm:$0xff]  }
 0x609   :  { %3113 = vmatpush3.bf16.msra.mxu1 %v4119_v34  ;;  %3133 = vmatpush3.bf16.msra.mxu0 %v4119_v34 }
 0x637   :  { %v1461_v50 = vpop.f32.mrb[36].mxu1 }
 0x638   :  { %v3042_v14 = vpop.f32.mrb[37].mxu1 }
 0x639   :  { %v1464_v15 = vpop.f32.mrb[38].mxu1  ;;  %v1509_v44 = vpop.f32.mrb[48].mxu0 }
 0x63a   :  { %v4131_v32 = vpack.c.bf16 %v1509_v44, %v1461_v50  ;;  %v3043_v22 = vpop.f32.mrb[39].mxu1  ;;  %v3048_v24 = vpop.f32.mrb[49].mxu0 }
 0x63b   :  { %v1512_v23 = vpop.f32.mrb[50].mxu0 }
 0x63c   :  { %v3049_v26 = vpop.f32.mrb[51].mxu0  ;;  %3114 = vmatprep.subr.bf16.mxu1 %v4131_v32  ;;  %3134 = vmatprep.subr.bf16.mxu0 %v4131_v32  ;;  %v3283_v23 = vld [vmem:[#allocation7] sm:$0xff]  }
 0x63d   :  { %3115 = vmatpush3.bf16.msra.mxu1 %v4131_v32  ;;  %3135 = vmatpush3.bf16.msra.mxu0 %v4131_v32  ;;  %v3284_v26 = vld [vmem:[#allocation7 + $0x8] sm:$0xff]  }
 0x63f   :  { %v1557_v27 = vpop.f32.mrb[40].mxu1 }
 0x640   :  { %v3054_v12 = vpop.f32.mrb[41].mxu1 }
 0x641   :  { %v1560_v31 = vpop.f32.mrb[42].mxu1  ;;  %v1605_v36 = vpop.f32.mrb[52].mxu0 }
 0x642   :  { %v4137_v28 = vpack.c.bf16 %v1605_v36, %v1557_v27  ;;  %v3055_v60 = vpop.f32.mrb[43].mxu1  ;;  %v3060_v30 = vpop.f32.mrb[53].mxu0 }
 0x643   :  { %v1608_v38 = vpop.f32.mrb[54].mxu0 }
 0x644   :  { %v3061_v39 = vpop.f32.mrb[55].mxu0  ;;  %3116 = vmatprep.subr.bf16.mxu1 %v4137_v28  ;;  %3136 = vmatprep.subr.bf16.mxu0 %v4137_v28 }
 0x645   :  { %3117 = vmatpush3.bf16.msra.mxu1 %v4137_v28  ;;  %3137 = vmatpush3.bf16.msra.mxu0 %v4137_v28 }
 0x647   :  { %v1653_v43 = vpop.f32.mrb[44].mxu1 }
 0x648   :  { %v3066_v40 = vpop.f32.mrb[45].mxu1 }
 0x649   :  { %v1656_v11 = vpop.f32.mrb[46].mxu1  ;;  %v1701_v46 = vpop.f32.mrb[56].mxu0 }
 0x64a   :  { %v4143_v37 = vpack.c.bf16 %v1701_v46, %v1653_v43  ;;  %v3067_v20 = vpop.f32.mrb[47].mxu1  ;;  %v3072_v61 = vpop.f32.mrb[57].mxu0 }
 0x64b   :  { %v1704_v51 = vpop.f32.mrb[58].mxu0 }
 0x64c   :  { %v3073_v25 = vpop.f32.mrb[59].mxu0  ;;  %3118 = vmatprep.subr.bf16.mxu1 %v4143_v37  ;;  %3138 = vmatprep.subr.bf16.mxu0 %v4143_v37 }
 0x64d   :  { %3119 = vmatpush3.bf16.msra.mxu1 %v4143_v37  ;;  %3139 = vmatpush3.bf16.msra.mxu0 %v4143_v37 }
 0x64f   :  { %v1749_v53 = vpop.f32.mrb[48].mxu1 }
 0x650   :  { %v3078_v54 = vpop.f32.mrb[49].mxu1 }
 0x651   :  { %v1752_v55 = vpop.f32.mrb[50].mxu1  ;;  %v1797_v56 = vpop.f32.mrb[60].mxu0 }
 0x652   :  { %v4149_v0 = vpack.c.bf16 %v1797_v56, %v1749_v53  ;;  %v3079_v57 = vpop.f32.mrb[51].mxu1  ;;  %v3084_v13 = vpop.f32.mrb[61].mxu0 }
 0x653   :  { %v1800_v45 = vpop.f32.mrb[62].mxu0 }
 0x654   :  { %v3085_v58 = vpop.f32.mrb[63].mxu0  ;;  %3120 = vmatprep.subr.bf16.mxu1 %v4149_v0  ;;  %3140 = vmatprep.subr.bf16.mxu0 %v4149_v0 }
 0x655   :  { %3121 = vmatpush3.bf16.msra.mxu1 %v4149_v0  ;;  %3141 = vmatpush3.bf16.msra.mxu0 %v4149_v0 }
 0x684   :  { %v1845_v17 = vpop.f32.mrb[52].mxu1 }
 0x685   :  { %v3090_v18 = vpop.f32.mrb[53].mxu1 }
 0x686   :  { %v1848_v62 = vpop.f32.mrb[54].mxu1  ;;  %v1893_v29 = vpop.f32.mrb[64].mxu0 }
 0x687   :  { %v2001_v48 = vpack.c.bf16 %v1893_v29, %v1845_v17  ;;  %v3091_v47 = vpop.f32.mrb[55].mxu1  ;;  %v3096_v4 = vpop.f32.mrb[65].mxu0 }
 0x688   :  { %v1896_v59 = vpop.f32.mrb[66].mxu0 }
 0x689   :  { %v3097_v63 = vpop.f32.mrb[67].mxu0  ;;  %3122 = vmatprep.subr.bf16.mxu1 %v2001_v48  ;;  %3142 = vmatprep.subr.bf16.mxu0 %v2001_v48 }
 0x68a   :  { %3123 = vmatpush3.bf16.msra.mxu1 %v2001_v48  ;;  %3143 = vmatpush3.bf16.msra.mxu0 %v2001_v48 }
 0x68f   :  { %v1941_v2 = vpop.f32.mrb[56].mxu1 }
 0x690   :  { %v3102_v52 = vpop.f32.mrb[57].mxu1 }
 0x691   :  { %v1944_v16 = vpop.f32.mrb[58].mxu1 }
 0x692   :  { %v3103_v21 = vpop.f32.mrb[59].mxu1 }
 0x696   :  { %v1989_v3 = vpop.f32.mrb[68].mxu0 }
 0x697   :  { %v2002_v19 = vpack.c.bf16 %v1989_v3, %v1941_v2  ;;  %v3108_v42 = vpop.f32.mrb[69].mxu0 }
 0x698   :  { %v1992_v1 = vpop.f32.mrb[70].mxu0 }
 0x699   :  { %v3109_v5 = vpop.f32.mrb[71].mxu0  ;;  %3124 = vmatprep.subr.bf16.mxu1 %v2002_v19  ;;  %3144 = vmatprep.subr.bf16.mxu0 %v2002_v19 }
 0x69a   :  { %3125 = vmatpush3.bf16.msra.mxu1 %v2002_v19  ;;  %3145 = vmatpush3.bf16.msra.mxu0 %v2002_v19  ;;  %v2336_v5 = vsub.s32 3, %v3632_v41 }
 0x69b   :  { %3150 = vmatprep.subr.bf16.mxu1 %v4113_v7  ;;  %3170 = vmatprep.subr.bf16.mxu0 %v4113_v7 }
 0x69d   :  { %3127 = vmatmul.mubr.bf16.vlgmr.msra.gmra.mrb[60].mxu1 %v3277_v33  ;;  %3147 = vmatmul.mubr.bf16.vlgmr.msra.gmra.mrb[72].mxu0 %v3278_v6  ;;  %v4214_v33 = vld [vmem:[#allocation2] sm:$0xff] }
 0x69e   :  { %3151 = vmatpush3.bf16.msra.mxu1 %v4113_v7  ;;  %3171 = vmatpush3.bf16.msra.mxu0 %v4113_v7  ;;  %v3280_v7 = vld [vmem:[%s4314_s6 + $0x28] sm:$0xff]   ;;  %v2337_v6 = vrot.slane %v4214_v33, %v2336_v5 }
 0x69f   :  { %3152 = vmatprep.subr.bf16.mxu1 %v4119_v34  ;;  %3172 = vmatprep.subr.bf16.mxu0 %v4119_v34 }
 0x6a0   :  { %3166 = vmatprep.mubr.bf16.mxu1 %v3279_v35  ;;  %3186 = vmatprep.mubr.bf16.mxu0 %v3281_v49 }
 0x6a2   :  { %3153 = vmatpush3.bf16.msra.mxu1 %v4119_v34  ;;  %3173 = vmatpush3.bf16.msra.mxu0 %v4119_v34  ;;  %v3282_v34 = vld [vmem:[%s4314_s6 + $0x38] sm:$0xff]   ;;  %s3511_s6 = smov 16  }
 0x6a3   :  { %3154 = vmatprep.subr.bf16.mxu1 %v4131_v32  ;;  %3174 = vmatprep.subr.bf16.mxu0 %v4131_v32 }
 0x6a6   :  { %3155 = vmatpush3.bf16.msra.mxu1 %v4131_v32  ;;  %3175 = vmatpush3.bf16.msra.mxu0 %v4131_v32 }
 0x6a7   :  { %3156 = vmatprep.subr.bf16.mxu1 %v4137_v28  ;;  %3176 = vmatprep.subr.bf16.mxu0 %v4137_v28 }
 0x6aa   :  { %3157 = vmatpush3.bf16.msra.mxu1 %v4137_v28  ;;  %3177 = vmatpush3.bf16.msra.mxu0 %v4137_v28 }
 0x6ab   :  { %3158 = vmatprep.subr.bf16.mxu1 %v4143_v37  ;;  %3178 = vmatprep.subr.bf16.mxu0 %v4143_v37 }
 0x6ae   :  { %3159 = vmatpush3.bf16.msra.mxu1 %v4143_v37  ;;  %3179 = vmatpush3.bf16.msra.mxu0 %v4143_v37 }
 0x6af   :  { %3160 = vmatprep.subr.bf16.mxu1 %v4149_v0  ;;  %3180 = vmatprep.subr.bf16.mxu0 %v4149_v0 }
 0x6b2   :  { %3161 = vmatpush3.bf16.msra.mxu1 %v4149_v0  ;;  %3181 = vmatpush3.bf16.msra.mxu0 %v4149_v0 }
 0x6b3   :  { %3162 = vmatprep.subr.bf16.mxu1 %v2001_v48  ;;  %3182 = vmatprep.subr.bf16.mxu0 %v2001_v48 }
 0x6b6   :  { %3163 = vmatpush3.bf16.msra.mxu1 %v2001_v48  ;;  %3183 = vmatpush3.bf16.msra.mxu0 %v2001_v48 }
 0x6b7   :  { %3164 = vmatprep.subr.bf16.mxu1 %v2002_v19  ;;  %3184 = vmatprep.subr.bf16.mxu0 %v2002_v19 }
 0x6ba   :  { %3165 = vmatpush3.bf16.msra.mxu1 %v2002_v19  ;;  %3185 = vmatpush3.bf16.msra.mxu0 %v2002_v19 }
 0x6bb   :  { %3190 = vmatprep.subr.bf16.mxu1 %v3283_v23 }
 0x6bd   :  { %3167 = vmatmul.mubr.bf16.vlgmr.msra.gmra.mrb[64].mxu1 %v3280_v7  ;;  %3187 = vmatmul.mubr.bf16.vlgmr.msra.gmra.mrb[76].mxu0 %v3282_v34 }
 0x6be   :  { %3191 = vmatpush3.bf16.msra.mxu1 %v3283_v23 }
 0x6bf   :  { %3192 = vmatprep.subr.bf16.mxu1 %v3284_v26 }
 0x6c2   :  { %3193 = vmatpush3.bf16.msra.mxu1 %v3284_v26 }
 0x770   :  { %v3128_v8 = vpop.f32.mrb[60].mxu1  ;;  %v3148_v9 = vpop.f32.mrb[72].mxu0 }
 0x771   :  { %v2053_v10 = vpop.f32.mrb[61].mxu1  ;;  %v2119_v50 = vpop.f32.mrb[73].mxu0 }
 0x772   :  { %v3129_v14 = vpop.f32.mrb[62].mxu1  ;;  %v3149_v15 = vpop.f32.mrb[74].mxu0 }
 0x773   :  { %v3243_v44 = vpack.i.bf16 %v3149_v15, %v3148_v9  ;;  %v2056_v32 = vpop.f32.mrb[63].mxu1  ;;  %v2122_v22 = vpop.f32.mrb[75].mxu0  ;;  %v3377_v15 = vld [vmem:[%s4308_s0 + $0x10] sm:$0xff] }
 0x774   :  { %v3248_v24 = vpack.i.bf16 %v2122_v22, %v2119_v50  ;;  %v3378_v22 = vld [vmem:[%s4308_s0 + $0x8] sm:$0xff] }
 0x775   :  { %3244 = vrot.lane.b32.xlu1 %v3243_v44, %s3510_s27 }
 0x776   :  { %3249 = vrot.lane.b32.xlu0 %v3248_v24, %s3510_s27 }
 0x790   :  { %v3168_v27 = vpop.f32.mrb[64].mxu1  ;;  %v3188_v12 = vpop.f32.mrb[76].mxu0 }
 0x791   :  { %v2185_v31 = vpop.f32.mrb[65].mxu1  ;;  %v2251_v36 = vpop.f32.mrb[77].mxu0 }
 0x792   :  { %v3169_v28 = vpop.f32.mrb[66].mxu1  ;;  %v3189_v60 = vpop.f32.mrb[78].mxu0 }
 0x793   :  { %v3253_v30 = vpack.i.bf16 %v3169_v28, %v3168_v27  ;;  %v2188_v38 = vpop.f32.mrb[67].mxu1  ;;  %v3268_v39 = vpack.i.bf16 %v3189_v60, %v3188_v12  ;;  %v2254_v43 = vpop.f32.mrb[79].mxu0  ;;  %v3379_v27 = vld [vmem:[%s4308_s0 + $0x18] sm:$0xff] }
 0x794   :  { %v3258_v40 = vpack.i.bf16 %v2188_v38, %v2185_v31  ;;  %v3263_v11 = vpack.i.bf16 %v2254_v43, %v2251_v36 }
 0x795   :  { %3254 = vrot.lane.b32.xlu1 %v3253_v30, %s3511_s6 }
 0x796   :  { %3259 = vrot.lane.b32.xlu0 %v3258_v40, %s3511_s6 }
 0x799   :  { %3269 = vrot.lane.b32.xlu1 %v3268_v39, %s3512_s28 }
 0x79a   :  { %3264 = vrot.lane.b32.xlu0 %v3263_v11, %s3512_s28 }
 0x7e7   :  { %v3245_v46 = vpop.permute.xlu1 %3244 }
 0x7e8   :  { %v3250_v37 = vpop.permute.xlu0 %3249  ;;  %v3247_v20 = vunpack.i.h.bf16 %v3245_v46  ;;  %v3246_v61 = vunpack.i.l.bf16 %v3245_v46 }
 0x7e9   :  { %v3252_v25 = vunpack.i.h.bf16 %v3250_v37  ;;  %v3251_v53 = vunpack.i.l.bf16 %v3250_v37 }
 0x7ea   :  { %v2316_v13 = vsel %vm267_vm2, %v3128_v8, %v3246_v61  ;;  %v2317_v45 = vsel %vm267_vm2, %v3129_v14, %v3247_v20 }
 0x7eb   :  { %v2314_v17 = vsel %vm267_vm2, %v2053_v10, %v3251_v53  ;;  %v2315_v18 = vsel %vm267_vm2, %v2056_v32, %v3252_v25  ;;  %v3376_v10 = vld [vmem:[%s4308_s0] sm:$0xff] }
 0x807   :  { %v3255_v51 = vpop.permute.xlu1 %3254 }
 0x808   :  { %v3260_v54 = vpop.permute.xlu0 %3259  ;;  %v3257_v55 = vunpack.i.h.bf16 %v3255_v51  ;;  %v3256_v56 = vunpack.i.l.bf16 %v3255_v51 }
 0x809   :  { %v3262_v0 = vunpack.i.h.bf16 %v3260_v54  ;;  %v3261_v57 = vunpack.i.l.bf16 %v3260_v54 }
 0x80a   :  { %v2322_v47 = vsel %vm2318_vm4, %v2317_v45, %v3257_v55  ;;  %v2321_v4 = vsel %vm2318_vm4, %v2316_v13, %v3256_v56  ;;  %v3285_v13 = vld [vmem:[#allocation8] sm:$0xff]   ;;  %v3286_v45 = vld [vmem:[#allocation8 + $0x8] sm:$0xff]  }
 0x80b   :  { %v3270_v58 = vpop.permute.xlu1 %3269  ;;  %v2320_v2 = vsel %vm2318_vm4, %v2315_v18, %v3262_v0  ;;  %v2319_v52 = vsel %vm2318_vm4, %v2314_v17, %v3261_v57  ;;  %3198 = vmatprep.subr.bf16.mxu0 %v3285_v13  ;;  %v3288_v17 = vld [vmem:[%s4313_s5 + $0x8] sm:$0xff]   ;;  %v3289_v18 = vld [vmem:[%s4313_s5 + $0x10] sm:$0xff]  }
 0x80c   :  { %v3272_v62 = vunpack.i.h.bf16 %v3270_v58  ;;  %v3271_v29 = vunpack.i.l.bf16 %v3270_v58  ;;  %v3265_v48 = vpop.permute.xlu0 %3264  ;;  %3199 = vmatpush3.bf16.msra.mxu0 %v3285_v13  ;;  %v3287_v58 = vld [vmem:[%s4313_s5] sm:$0xff]  }
 0x80d   :  { %v3267_v59 = vunpack.i.h.bf16 %v3265_v48  ;;  %v3266_v63 = vunpack.i.l.bf16 %v3265_v48  ;;  %3200 = vmatprep.subr.bf16.mxu0 %v3286_v45  ;;  %3206 = vmatprep.subr.bf16.mxu1 %v3287_v58 }
 0x80e   :  { %v2326_v16 = vsel %vm2323_vm5, %v2321_v4, %v3271_v29  ;;  %v2327_v21 = vsel %vm2323_vm5, %v2322_v47, %v3272_v62  ;;  %v3290_v62 = vld [vmem:[%s4313_s5 + $0x18] sm:$0xff]   ;;  %v3291_v29 = vld [vmem:[%s4313_s5 + $0x20] sm:$0xff]  }
 0x80f   :  { %v2333_v3 = vpack.c.bf16 %v2327_v21, %v2326_v16  ;;  %v2324_v19 = vsel %vm2323_vm5, %v2319_v52, %v3266_v63  ;;  %v2325_v42 = vsel %vm2323_vm5, %v2320_v2, %v3267_v59 }
 0x810   :  { %v2332_v1 = vpack.c.bf16 %v2325_v42, %v2324_v19  ;;  %3201 = vmatpush3.bf16.msra.mxu0 %v3286_v45  ;;  %v2463_v42 = vsub.s32 4, %v3632_v41 }
 0x812   :  { %3194 = vmatprep.mubr.msk.bf16.mxu1 %vm86_vm0, %v2332_v1  ;;  %v2464_v5 = vrot.slane %v4214_v33, %v2463_v42 }
 0x813   :  { %3195 = vmatmul.mubr.msk.bf16.vlgmr.msra.gmra.mrb[68].mxu1 %vm86_vm0, %v2333_v3 }
 0x814   :  { %3207 = vmatpush3.bf16.msra.mxu1 %v3287_v58 }
 0x815   :  { %3208 = vmatprep.subr.bf16.mxu1 %v3288_v17 }
 0x818   :  { %3209 = vmatpush3.bf16.msra.mxu1 %v3288_v17 }
 0x819   :  { %3210 = vmatprep.subr.bf16.mxu1 %v3289_v18 }
 0x81c   :  { %3211 = vmatpush3.bf16.msra.mxu1 %v3289_v18 }
 0x81d   :  { %3212 = vmatprep.subr.bf16.mxu1 %v3290_v62 }
 0x820   :  { %3213 = vmatpush3.bf16.msra.mxu1 %v3290_v62 }
 0x821   :  { %3214 = vmatprep.subr.bf16.mxu1 %v3291_v29 }
 0x824   :  { %3215 = vmatpush3.bf16.msra.mxu1 %v3291_v29  ;;  %v2586_v29 = vsub.s32 7, %v3632_v41 }
 0x8e6   :  { %v3196_v35 = vpop.f32.mrb[68].mxu1 }
 0x8e7   :  { %v2390_v49 = vpop.f32.mrb[69].mxu1  ;;  %v2399_v7 = vadd.f32 %v3196_v35, %v2337_v6 }
 0x8e8   :  { %v2391_v34 = vadd.f32 %v2390_v49, %v2337_v6  ;;  %v3197_v8 = vpop.f32.mrb[70].mxu1 }
 0x8e9   :  { %v2393_v9 = vpop.f32.mrb[71].mxu1  ;;  %v4225_v44 = vadd.f32 %v3377_v15, %v2399_v7  ;;  %v2402_v32 = vadd.f32 %v3197_v8, %v2337_v6 }
 0x8ea   :  { %v4220_v50 = vadd.f32 %v3376_v10, %v2391_v34  ;;  %v2394_v14 = vadd.f32 %v2393_v9, %v2337_v6  ;;  %v2471_v6 = vsub.s32 5, %v3632_v41 }
 0x8eb   :  { %v4239_v12 = vadd.f32 %v3379_v27, %v2402_v32  ;;  %v2415_v31 = vsel %vm86_vm0, %v4225_v44, 0.0 }
 0x8ec   :  { %v4230_v24 = vadd.f32 %v3378_v22, %v2394_v14  ;;  %v2409_v23 = vsel %vm86_vm0, %v4220_v50, 0.0  ;;  %v2472_v9 = vrot.slane %v4214_v33, %v2471_v6 }
 0x8ed   :  { %2410 = vadd.xlane.f32.xlu0 %v2409_v23  ;;  %v2418_v36 = vsel %vm86_vm0, %v4239_v12, 0.0 }
 0x8ee   :  { %v2412_v26 = vsel %vm86_vm0, %v4230_v24, 0.0 }
 0x8ef   :  { %2413 = vadd.xlane.f32.xlu1 %v2412_v26 }
 0x8f1   :  { %2416 = vadd.xlane.f32.xlu0 %v2415_v31 }
 0x8f5   :  { %2419 = vadd.xlane.f32.xlu0 %v2418_v36 }
 0x97a   :  { %v2411_v28 = vpop.xlane.xlu0 %2410 }
 0x97b   :  { %v2421_v60 = vmul.f32 0.03125, %v2411_v28 }
 0x97c   :  { %v2414_v30 = vpop.xlane.xlu1 %2413 }
 0x97d   :  { %v2425_v38 = vsub.f32 %v4220_v50, %v2421_v60  ;;  %v2422_v39 = vmul.f32 0.03125, %v2414_v30 }
 0x97e   :  { %v2417_v43 = vpop.xlane.xlu0 %2416 }
 0x97f   :  { %v2426_v40 = vsub.f32 %v4230_v24, %v2422_v39  ;;  %v2423_v11 = vmul.f32 0.03125, %v2417_v43  ;;  %v2429_v46 = vmul.f32 %v2425_v38, %v2425_v38  ;;  %v3293_v39 = vld [vmem:[%s4313_s5 + $0x30] sm:$0xff]   ;;  %v3294_v43 = vld [vmem:[%s4313_s5 + $0x38] sm:$0xff]  }
 0x981   :  { %v2427_v37 = vsub.f32 %v4225_v44, %v2423_v11  ;;  %v2433_v20 = vsel %vm86_vm0, %v2429_v46, 0.0  ;;  %v2430_v61 = vmul.f32 %v2426_v40, %v2426_v40 }
 0x982   :  { %2434 = vadd.xlane.f32.xlu0 %v2433_v20  ;;  %v2420_v51 = vpop.xlane.xlu0 %2419 }
 0x983   :  { %v2424_v25 = vmul.f32 0.03125, %v2420_v51  ;;  %v2436_v53 = vsel %vm86_vm0, %v2430_v61, 0.0  ;;  %v2431_v54 = vmul.f32 %v2427_v37, %v2427_v37 }
 0x984   :  { %2437 = vadd.xlane.f32.xlu1 %v2436_v53 }
 0x985   :  { %v2428_v55 = vsub.f32 %v4239_v12, %v2424_v25  ;;  %v2439_v56 = vsel %vm86_vm0, %v2431_v54, 0.0 }
 0x986   :  { %2440 = vadd.xlane.f32.xlu0 %v2439_v56 }
 0x987   :  { %v2432_v0 = vmul.f32 %v2428_v55, %v2428_v55 }
 0x989   :  { %v2442_v57 = vsel %vm86_vm0, %v2432_v0, 0.0 }
 0x98a   :  { %2443 = vadd.xlane.f32.xlu1 %v2442_v57 }
 0xa0f   :  { %v2435_v48 = vpop.xlane.xlu0 %2434 }
 0xa10   :  { %v2445_v47 = vmul.f32 0.03125, %v2435_v48  ;;  %v2587_v48 = vrot.slane %v4214_v33, %v2586_v29 }
 0xa11   :  { %v2438_v4 = vpop.xlane.xlu1 %2437 }
 0xa12   :  { %v2449_v59 = vadd.f32 1e-05, %v2445_v47  ;;  %v2446_v63 = vmul.f32 0.03125, %v2438_v4 }
 0xa13   :  { %v2441_v2 = vpop.xlane.xlu0 %2440 }
 0xa14   :  { %3367 = vrsqrt.f32 %v2449_v59  ;;  %v2450_v52 = vadd.f32 1e-05, %v2446_v63  ;;  %v2447_v16 = vmul.f32 0.03125, %v2441_v2 }
 0xa16   :  { %3369 = vrsqrt.f32 %v2450_v52  ;;  %v2451_v21 = vadd.f32 1e-05, %v2447_v16 }
 0xa17   :  { %v2444_v3 = vpop.xlane.xlu1 %2443 }
 0xa18   :  { %3371 = vrsqrt.f32 %v2451_v21  ;;  %v2448_v19 = vmul.f32 0.03125, %v2444_v3 }
 0xa1a   :  { %v2452_v1 = vadd.f32 1e-05, %v2448_v19 }
 0xa1c   :  { %3373 = vrsqrt.f32 %v2452_v1 }
 0xa1e   :  { %v3368_v35 = vpop.eup %3367 }
 0xa1f   :  { %v2457_v49 = vmul.f32 %v3368_v35, %v2425_v38  ;;  %v3292_v38 = vld [vmem:[%s4313_s5 + $0x28] sm:$0xff]   ;;  %s3513_s5 = smov [#allocation10]  }
 0xa20   :  { %v3370_v7 = vpop.eup %3369  ;;  %3216 = vmatprep.subr.bf16.mxu1 %v3292_v38  ;;  %s2698_s18 = sshll.u32 %s3513_s5, 4  ;;  %s2699_s18 = int_to_ptr.vmem [resolvable:$true] %s2698_s18 }
 0xa21   :  { %v2458_v34 = vmul.f32 %v3370_v7, %v2426_v40  ;;  %v2465_v8 = vmul.f32 %v2464_v5, %v2457_v49  ;;  %3217 = vmatpush3.bf16.msra.mxu1 %v3292_v38  ;;  %v2485_v40 = vsub.s32 6, %v3632_v41  ;;  %s3468_s25 = scalar_lea.vmem %s2699_s18, 512  ;;  %p3473_p5 = scmp.lt.s32.totalorder %s2699_s18, %s2699_s18 }
 0xa22   :  { %v3372_v10 = vpop.eup %3371  ;;  %3218 = vmatprep.subr.bf16.mxu1 %v3293_v39  ;;  %p3469_p4 = scmp.ne.s32.totalorder %s2699_s18, %s3468_s25  ;;  %p3474_p6 = scmp.lt.s32.totalorder %s3468_s25, %s3468_s25 }
 0xa23   :  { %v2459_v14 = vmul.f32 %v3372_v10, %v2427_v37  ;;  %v2466_v15 = vmul.f32 %v2464_v5, %v2458_v34  ;;  %v2473_v32 = vadd.f32 %v2472_v9, %v2465_v8  ;;  %v2486_v11 = vrot.slane %v4214_v33, %v2485_v40 }
 0xa24   :  { %p3475_p7 = por %p3474_p6, %p3473_p5 }
 0xa25   :  { %v2474_v22 = vadd.f32 %v2472_v9, %v2466_v15  ;;  %v2467_v26 = vmul.f32 %v2464_v5, %v2459_v14  ;;  %3219 = vmatpush3.bf16.msra.mxu1 %v3293_v39 }
 0xa26   :  { %v3374_v23 = vpop.eup %3373  ;;  %3220 = vmatprep.subr.bf16.mxu1 %v3294_v43  ;;  %p3476_p8 = pnand %p3475_p7, %p3469_p4 }
 0xa27   :  { %v2460_v27 = vmul.f32 %v3374_v23, %v2428_v55  ;;  %v2481_v31 = vpack.c.bf16 %v2474_v22, %v2473_v32  ;;  %v2475_v28 = vadd.f32 %v2472_v9, %v2467_v26 }
 0xa29   :  { %v2468_v36 = vmul.f32 %v2464_v5, %v2460_v27  ;;  %3202 = vmatprep.mubr.msk.bf16.mxu0 %vm86_vm0, %v2481_v31  ;;  %3221 = vmatpush3.bf16.msra.mxu1 %v3294_v43 }
 0xa2b   :  { %v2476_v60 = vadd.f32 %v2472_v9, %v2468_v36 }
 0xa2d   :  { %v2482_v30 = vpack.c.bf16 %v2476_v60, %v2475_v28 }
 0xa2f   :  { %3203 = vmatmul.mubr.msk.bf16.vlgmr.msra.gmra.mrb[80].mxu0 %vm86_vm0, %v2482_v30 }
 0xb02   :  { %v3204_v46 = vpop.f32.mrb[80].mxu0 }
 0xb03   :  { %v2548_v37 = vadd.f32 %v3204_v46, %v2486_v11  ;;  %v2539_v20 = vpop.f32.mrb[81].mxu0 }
 0xb04   :  { %v2540_v61 = vadd.f32 %v2539_v20, %v2486_v11  ;;  %v3205_v51 = vpop.f32.mrb[82].mxu0 }
 0xb05   :  { %v2560_v25 = vmul.f32 0.01, %v2548_v37  ;;  %v2551_v53 = vadd.f32 %v3205_v51, %v2486_v11  ;;  %v2542_v54 = vpop.f32.mrb[83].mxu0  ;;  %vm2556_vm6 = vcmp.ge.f32.partialorder %v2548_v37, 0.0 }
 0xb06   :  { %v2558_v55 = vmul.f32 0.01, %v2540_v61  ;;  %v2543_v56 = vadd.f32 %v2542_v54, %v2486_v11  ;;  %vm2554_vm7 = vcmp.ge.f32.partialorder %v2540_v61, 0.0 }
 0xb07   :  { %vm2557_vm8 = vcmp.ge.f32.partialorder %v2551_v53, 0.0  ;;  %v2561_v0 = vmul.f32 0.01, %v2551_v53  ;;  %v2564_v13 = vsel %vm2556_vm6, %v2548_v37, %v2560_v25 }
 0xb08   :  { %vm2555_vm9 = vcmp.ge.f32.partialorder %v2543_v56, 0.0  ;;  %v2559_v57 = vmul.f32 0.01, %v2543_v56  ;;  %v2562_v17 = vsel %vm2554_vm7, %v2540_v61, %v2558_v55 }
 0xb09   :  { %v2565_v45 = vsel %vm2557_vm8, %v2551_v53, %v2561_v0 }
 0xb0a   :  { %v2583_v58 = vpack.c.bf16 %v2565_v45, %v2564_v13  ;;  %v2563_v18 = vsel %vm2555_vm9, %v2543_v56, %v2559_v57 }
 0xb0b   :  { %v2582_v62 = vpack.c.bf16 %v2563_v18, %v2562_v17 }
 0xb0d   :  { %3222 = vmatprep.mubr.bf16.mxu1 %v2582_v62 }
 0xb0e   :  { %3223 = vmatmul.mubr.bf16.vlgmr.msra.gmra.mrb[72].mxu1 %v2583_v58 }
 0xbe1   :  { %v3224_v47 = vpop.f32.mrb[72].mxu1 }
 0xbe2   :  { %v2679_v4 = vadd.f32 %v3224_v47, %v2587_v48  ;;  %v2670_v59 = vpop.f32.mrb[73].mxu1 }
 0xbe3   :  { %v2671_v63 = vadd.f32 %v2670_v59, %v2587_v48  ;;  %v3225_v2 = vpop.f32.mrb[74].mxu1 }
 0xbe4   :  { %v2687_v52 = vadd.f32 %v2679_v4, %v4225_v44  ;;  %v2682_v16 = vadd.f32 %v3225_v2, %v2587_v48  ;;  %v2673_v21 = vpop.f32.mrb[75].mxu1 }
 0xbe5   :  { %v2685_v3 = vadd.f32 %v2671_v63, %v4220_v50  ;;  %v2674_v19 = vadd.f32 %v2673_v21, %v2587_v48 }
 0xbe6   :  { %2691 = vst.msk [vmem:[#allocation10 + $0x10] sm:$0xff] %vm86_vm0, %v2687_v52  ;;  %v2688_v41 = vadd.f32 %v2682_v16, %v4239_v12 }
 0xbe7   :  { %2689 = vst.msk [vmem:[#allocation10] sm:$0xff] %vm86_vm0, %v2685_v3  ;;  %v2686_v33 = vadd.f32 %v2674_v19, %v4230_v24 }
 0xbe8   :  { %2692 = vst.msk [vmem:[#allocation10 + $0x18] sm:$0xff] %vm86_vm0, %v2688_v41 }
 0xbe9   :  { %2690 = vst.msk [vmem:[#allocation10 + $0x8] sm:$0xff] %vm86_vm0, %v2686_v33 }
 0xbea   :  { %3479 = shalt.err (!%p3476_p8)
}
 0xbeb   :  { %s3480_s29 = scalar_lea.hbm %s4315_s7, 512 }
 0xbec   :  { %p3481_p9 = scmp.ne.s32.totalorder %s4315_s7, %s3480_s29  ;;  %p3484_p10 = scmp.lt.u32.totalorder %s3480_s29, %s4315_s7 }
 0xbee   :  { %p3486_p11 = pnand %p3484_p10, %p3481_p9 }
 0xbf0   :  { %3489 = shalt.err (!%p3486_p11)
}
 0xbf1   :  { %s3514_s9 = smov 128  }
 0xbf2   :  { %2704 = dma.vmem_to_hbm [thread:$0]  %s2699_s18, 512, %s4315_s7, [#allocation4], %s3514_s9, %s3514_s9, %s3510_s27  }
 0xbf3   :  { %3496 = dma.done.wait [#allocation4], 512  }
 0xbf4   :  { %3497 = vsyncadd [#allocation4], 4294966784 }
 0xbf5   :  { %2708 = vsyncpa [#allocation3], 1 }
 0xbf6   :  { %2709 = vsyncpa [#allocation6], 1 }
 0xbf7   :  { %2710 = vsyncpa [#allocation9], 1 }
 0xbf8   :  { %2711 = vsyncpa [#allocation4], 1 }

</bundles_post_ra>
